<compile_context>
chip_gen: v7x
topology: tpu7x:2x2x1
jax: 0.10.0
libtpu: 0.0.40
codegen_flags: <defaults>
</compile_context>

<pallas_src>
import functools

import jax
import jax.numpy as jnp
from jax import lax
from jax.experimental import pallas as pl
from jax.experimental.pallas import tpu as pltpu


# ---------------------------------------------------------------------------
# Fused kernel: Nb images per grid step as one lane-dense (Nb*H, W*C) slab.
# ---------------------------------------------------------------------------
def _basic_block_kernel(x_ref, m1_ref, b1_ref, m2_ref, b2_ref, o_ref, *, H):
    M, WC = x_ref.shape
    x = x_ref[...]                                        # (M, W*C) f32 slab

    # Image-boundary masks for the ky = -1 / +1 row shifts (the slab stacks Nb
    # images of H rows each).  Built once per grid step; pure VPU work with
    # slack once the MXU is the binding unit.
    row = lax.broadcasted_iota(jnp.int32, (M, WC), 0)
    has_above = (row % H) != 0            # row h-1 exists within the same image
    has_below = (row % H) != (H - 1)      # row h+1 exists within the same image

    def conv_bn(a, m_ref, b_ref):
        # ky taps via XLU sublane rotations (off the MXU); kx taps + W padding
        # live inside the banded bf16 weights.  f32 accumulation on the MXU.
        a_dn = jnp.where(has_above, pltpu.roll(a, 1, axis=0), 0.0)      # a[h-1]
        a_up = jnp.where(has_below, pltpu.roll(a, M - 1, axis=0), 0.0)  # a[h+1]
        acc = jnp.dot(a_dn.astype(jnp.bfloat16), m_ref[0],
                      preferred_element_type=jnp.float32)
        acc = acc + jnp.dot(a.astype(jnp.bfloat16), m_ref[1],
                            preferred_element_type=jnp.float32)
        acc = acc + jnp.dot(a_up.astype(jnp.bfloat16), m_ref[2],
                            preferred_element_type=jnp.float32)
        return acc + b_ref[...]                           # folded-BN bias (1, W*C) f32

    h1 = jnp.maximum(conv_bn(x, m1_ref, b1_ref), 0.0)     # conv1 + bn1 + relu
    out = conv_bn(h1, m2_ref, b2_ref) + x                 # conv2 + bn2 + residual
    o_ref[...] = jnp.maximum(out, 0.0).astype(o_ref.dtype)  # final relu


# ---------------------------------------------------------------------------
# Trace-time weight preparation (pure JAX, outside the kernel).
# ---------------------------------------------------------------------------
def _fold_bn(gamma, beta, mean, var, eps=1e-5):
    scale = gamma / jnp.sqrt(var + eps)
    bias = beta - mean * scale
    return scale, bias


def _banded_weights(w_hwio, scale, W):
    """Fold the BN scale into the conv weights and build, for each ky tap, the
    banded (W*Cin, W*Cout) matrix implementing the kx taps + zero padding in W.
    """
    KH, KW, Cin, Cout = w_hwio.shape
    wf = w_hwio.astype(jnp.float32) * scale.astype(jnp.float32).reshape(1, 1, 1, Cout)
    wi = jnp.arange(W)[:, None]                       # input  column index
    wo = jnp.arange(W)[None, :]                       # output column index
    kx = wi - wo + 1                                  # tap index, valid in [0, KW)
    valid = ((kx >= 0) & (kx < KW)).astype(jnp.float32)
    kx_c = jnp.clip(kx, 0, KW - 1)
    m = wf[:, kx_c] * valid[None, :, :, None, None]   # (KH, W, W, Cin, Cout)
    m = jnp.transpose(m, (0, 1, 3, 2, 4)).reshape(KH, W * Cin, W * Cout)
    return m


def _pick_batch_tile(N, H, target_rows=512):
    """Largest per-step batch tile Nb such that the (Nb*H, W*C) slab keeps the
    MXU rows busy (M up to ~512), the sublane dim stays 8-aligned, and (when N
    allows) at least 2 grid steps remain (v7x has two TensorCores)."""
    divisors = [d for d in range(1, N + 1) if N % d == 0]
    ok = [d for d in divisors if d * H <= target_rows and (d * H) % 8 == 0]
    if not ok:
        return N                              # single full-array block (always legal)
    multi = [d for d in ok if N // d >= 2]
    return max(multi) if multi else max(ok)


# ---------------------------------------------------------------------------
# Forward wrappers.
# ---------------------------------------------------------------------------
def basic_block_forward_nhwc(x_nhwc, params):
    """BasicBlock forward (stride=1, downsample=None) in NHWC, f32 in/out."""
    N, H, W, C = x_nhwc.shape
    assert params["w1_hwio"].shape == (3, 3, C, C)
    assert params["w2_hwio"].shape == (3, 3, C, C)
    WC = W * C
    assert WC % 128 == 0, "W*C must be a multiple of 128 lanes for unmasked stores"

    s1, b1 = _fold_bn(params["bn1_gamma"], params["bn1_beta"],
                      params["bn1_mean"], params["bn1_var"])
    s2, b2 = _fold_bn(params["bn2_gamma"], params["bn2_beta"],
                      params["bn2_mean"], params["bn2_var"])

    # Banded conv+BN weights as bf16 MXU operands (exact kx-band structure,
    # BN scale folded in); biases stay f32.
    m1 = _banded_weights(params["w1_hwio"], s1, W).astype(jnp.bfloat16)  # (3, W*C, W*C)
    m2 = _banded_weights(params["w2_hwio"], s2, W).astype(jnp.bfloat16)
    b1f = jnp.tile(b1.astype(jnp.float32), W).reshape(1, WC)
    b2f = jnp.tile(b2.astype(jnp.float32), W).reshape(1, WC)

    # (N,H,W,C) -> (N*H, W*C) is a free row-major reshape (lane-dense slabs).
    x_flat = x_nhwc.astype(jnp.float32).reshape(N * H, WC)

    Nb = _pick_batch_tile(N, H)
    M = Nb * H                       # slab rows per grid step
    grid = (N // Nb,)

    kernel = functools.partial(_basic_block_kernel, H=H)

    # Cost estimate: 2 convs x 3 ky taps x (N*H, WC) @ (WC, WC) matmuls.
    flops = int(2 * 3 * 2 * (N * H) * WC * WC)
    bytes_accessed = int(4 * (2 * N * H * WC) + 2 * (2 * 3 * WC * WC) + 2 * (4 * WC))

    # Explicit scoped-VMEM budget: double-buffered in/out blocks + resident
    # weights, with headroom (raised above the 16/32 MiB defaults when needed).
    block_bytes = M * WC * 4
    weight_bytes = 2 * 3 * WC * WC * 2 + 2 * WC * 4
    vmem_limit = int(min(max(4 * block_bytes + 2 * weight_bytes + (8 << 20),
                             32 << 20), 64 << 20))

    out_flat = pl.pallas_call(
        kernel,
        out_shape=jax.ShapeDtypeStruct((N * H, WC), jnp.float32),
        grid=grid,
        in_specs=[
            pl.BlockSpec((M, WC), lambda n: (n, 0)),        # x slab (residual too)
            pl.BlockSpec((3, WC, WC), lambda n: (0, 0, 0)),  # banded conv1 (+bn1 scale), bf16
            pl.BlockSpec((1, WC), lambda n: (0, 0)),         # bn1 bias, f32
            pl.BlockSpec((3, WC, WC), lambda n: (0, 0, 0)),  # banded conv2 (+bn2 scale), bf16
            pl.BlockSpec((1, WC), lambda n: (0, 0)),         # bn2 bias, f32
        ],
        out_specs=pl.BlockSpec((M, WC), lambda n: (n, 0)),
        compiler_params=pltpu.CompilerParams(
            dimension_semantics=("parallel",),
            vmem_limit_bytes=vmem_limit),
        cost_estimate=pl.CostEstimate(flops=flops, transcendentals=0,
                                      bytes_accessed=bytes_accessed),
    )(x_flat, m1, b1f, m2, b2f)

    return out_flat.reshape(N, H, W, C)


def basic_block_forward(x_nchw, params):
    """PyTorch-layout adapter: NCHW in/out.  When chaining BasicBlocks, prefer
    basic_block_forward_nhwc (or the flat (N*H, W*C) layout) and only transpose
    at model entry/exit — each transpose is an extra HBM read+write."""
    x = jnp.transpose(x_nchw, (0, 2, 3, 1)).astype(jnp.float32)
    out = basic_block_forward_nhwc(x, params)
    return jnp.transpose(out, (0, 3, 1, 2))


# ---------------------------------------------------------------------------
# Pure-JAX reference (lax.conv) for the correctness check.
# ---------------------------------------------------------------------------
def _reference_forward(x_nchw, params):
    x = x_nchw.astype(jnp.float32)

    def conv(x, w_hwio):
        w_oihw = jnp.transpose(w_hwio, (3, 2, 0, 1))
        return jax.lax.conv_general_dilated(
            x, w_oihw, window_strides=(1, 1), padding=((1, 1), (1, 1)),
            dimension_numbers=("NCHW", "OIHW", "NCHW"))

    def bn(y, g, b, m, v, eps=1e-5):
        s = g / jnp.sqrt(v + eps)
        return y * s.reshape(1, -1, 1, 1) + (b - m * s).reshape(1, -1, 1, 1)

    out = conv(x, params["w1_hwio"])
    out = bn(out, params["bn1_gamma"], params["bn1_beta"],
             params["bn1_mean"], params["bn1_var"])
    out = jnp.maximum(out, 0.0)
    out = conv(out, params["w2_hwio"])
    out = bn(out, params["bn2_gamma"], params["bn2_beta"],
             params["bn2_mean"], params["bn2_var"])
    out = out + x
    return jnp.maximum(out, 0.0)


if __name__ == "__main__":
    key = jax.random.PRNGKey(0)
    # inplanes == planes == 8, stride=1 -> W*C = 128 lanes; N=16 images batch
    # into grid=(2,) steps of (128, 128) slabs (full MXU rows, 2 TC-parallel
    # steps for v7x).
    N, C, H, W = 16, 8, 16, 16
    k = jax.random.split(key, 11)

    x = jax.random.normal(k[0], (N, C, H, W), jnp.float32)

    # Deterministic synthetic parameters (PyTorch conv weight layout OIHW -> HWIO).
    w1_oihw = jax.random.normal(k[1], (C, C, 3, 3), jnp.float32) * 0.1
    w2_oihw = jax.random.normal(k[2], (C, C, 3, 3), jnp.float32) * 0.1
    params = dict(
        w1_hwio=jnp.transpose(w1_oihw, (2, 3, 1, 0)),
        w2_hwio=jnp.transpose(w2_oihw, (2, 3, 1, 0)),
        bn1_gamma=1.0 + 0.1 * jax.random.normal(k[3], (C,), jnp.float32),
        bn1_beta=0.1 * jax.random.normal(k[4], (C,), jnp.float32),
        bn1_mean=0.05 * jax.random.normal(k[5], (C,), jnp.float32),
        bn1_var=jnp.abs(1.0 + 0.1 * jax.random.normal(k[6], (C,), jnp.float32)),
        bn2_gamma=1.0 + 0.1 * jax.random.normal(k[7], (C,), jnp.float32),
        bn2_beta=0.1 * jax.random.normal(k[8], (C,), jnp.float32),
        bn2_mean=0.05 * jax.random.normal(k[9], (C,), jnp.float32),
        bn2_var=jnp.abs(1.0 + 0.1 * jax.random.normal(k[10], (C,), jnp.float32)),
    )
    # TODO(synk): BatchNorm is evaluated in inference mode (running stats); PyTorch
    # training-mode batch statistics are not reproduced here.

    out = basic_block_forward(x, params)
    jax.block_until_ready(out)

    ref = _reference_forward(x, params)
    assert out.shape == (N, C, H, W)
    max_err = float(jnp.max(jnp.abs(out - ref)))
    # Tolerance loosened vs. the f32 version: MXU operands are bf16 (f32 acc).
    assert jnp.allclose(out, ref, atol=5e-2, rtol=5e-2), f"mismatch vs reference: {max_err}"

    print("KERNEL_OK")
</pallas_src>

<mosaic_0001>
module attributes {stable_mosaic.version = 11 : i64} {
  func.func @_basic_block_kernel(%arg0: i32, %arg1: memref<128x128xf32, #tpu.memory_space<vmem>>, %arg2: memref<3x128x128xbf16, #tpu.memory_space<vmem>>, %arg3: memref<1x128xf32, #tpu.memory_space<vmem>>, %arg4: memref<3x128x128xbf16, #tpu.memory_space<vmem>>, %arg5: memref<1x128xf32, #tpu.memory_space<vmem>>, %arg6: memref<128x128xf32, #tpu.memory_space<vmem>>) attributes {dimension_semantics = [#tpu.dimension_semantics<parallel>], iteration_bounds = array<i64: 2>, scalar_prefetch = 0 : i64, scratch_operands = 0 : i64, tpu.core_type = #tpu.core_type<tc>, window_params = [{transform_indices = @transform_0, window_bounds = array<i64: 128, 128>}, {pipeline_mode = #tpu.pipeline_mode<synchronous>, transform_indices = @transform_1, window_bounds = array<i64: 3, 128, 128>}, {pipeline_mode = #tpu.pipeline_mode<synchronous>, transform_indices = @transform_2, window_bounds = array<i64: 1, 128>}, {pipeline_mode = #tpu.pipeline_mode<synchronous>, transform_indices = @transform_3, window_bounds = array<i64: 3, 128, 128>}, {pipeline_mode = #tpu.pipeline_mode<synchronous>, transform_indices = @transform_4, window_bounds = array<i64: 1, 128>}, {transform_indices = @transform_5, window_bounds = array<i64: 128, 128>}]} {
    %c0 = arith.constant 0 : index
    %c0_0 = arith.constant 0 : index
    %0 = vector.load %arg1[%c0, %c0_0] : memref<128x128xf32, #tpu.memory_space<vmem>>, vector<128x128xf32>
    %1 = tpu.iota {dimensions = array<i32: 0>} : vector<128x128xi32>
    %c16_i32 = arith.constant 16 : i32
    %c0_i32 = arith.constant 0 : i32
    %2 = arith.cmpi eq, %c16_i32, %c0_i32 : i32
    %c1_i32 = arith.constant 1 : i32
    %3 = arith.select %2, %c1_i32, %c16_i32 : i32
    %4 = vector.broadcast %3 : i32 to vector<128x128xi32>
    %5 = arith.remsi %1, %4 : vector<128x128xi32>
    %c0_i32_1 = arith.constant 0 : i32
    %6 = vector.broadcast %c0_i32_1 : i32 to vector<128x128xi32>
    %7 = arith.cmpi ne, %5, %6 : vector<128x128xi32>
    %c0_i32_2 = arith.constant 0 : i32
    %8 = vector.broadcast %c0_i32_2 : i32 to vector<128x128xi32>
    %9 = arith.cmpi slt, %5, %8 : vector<128x128xi32>
    %c0_i32_3 = arith.constant 0 : i32
    %10 = arith.cmpi slt, %3, %c0_i32_3 : i32
    %11 = vector.broadcast %10 : i1 to vector<128x128xi1>
    %12 = vector.broadcast %11 : vector<128x128xi1> to vector<128x128xi1>
    %13 = arith.xori %9, %12 : vector<128x128xi1>
    %14 = arith.andi %13, %7 : vector<128x128xi1>
    %15 = vector.broadcast %3 : i32 to vector<128x128xi32>
    %16 = arith.addi %5, %15 : vector<128x128xi32>
    %17 = arith.select %14, %16, %5 : vector<128x128xi1>, vector<128x128xi32>
    %c0_i32_4 = arith.constant 0 : i32
    %18 = vector.broadcast %c0_i32_4 : i32 to vector<128x128xi32>
    %19 = arith.cmpi ne, %17, %18 : vector<128x128xi32>
    %c16_i32_5 = arith.constant 16 : i32
    %c0_i32_6 = arith.constant 0 : i32
    %20 = arith.cmpi eq, %c16_i32_5, %c0_i32_6 : i32
    %c1_i32_7 = arith.constant 1 : i32
    %21 = arith.select %20, %c1_i32_7, %c16_i32_5 : i32
    %22 = vector.broadcast %21 : i32 to vector<128x128xi32>
    %23 = arith.remsi %1, %22 : vector<128x128xi32>
    %c0_i32_8 = arith.constant 0 : i32
    %24 = vector.broadcast %c0_i32_8 : i32 to vector<128x128xi32>
    %25 = arith.cmpi ne, %23, %24 : vector<128x128xi32>
    %c0_i32_9 = arith.constant 0 : i32
    %26 = vector.broadcast %c0_i32_9 : i32 to vector<128x128xi32>
    %27 = arith.cmpi slt, %23, %26 : vector<128x128xi32>
    %c0_i32_10 = arith.constant 0 : i32
    %28 = arith.cmpi slt, %21, %c0_i32_10 : i32
    %29 = vector.broadcast %28 : i1 to vector<128x128xi1>
    %30 = vector.broadcast %29 : vector<128x128xi1> to vector<128x128xi1>
    %31 = arith.xori %27, %30 : vector<128x128xi1>
    %32 = arith.andi %31, %25 : vector<128x128xi1>
    %33 = vector.broadcast %21 : i32 to vector<128x128xi32>
    %34 = arith.addi %23, %33 : vector<128x128xi32>
    %35 = arith.select %32, %34, %23 : vector<128x128xi1>, vector<128x128xi32>
    %c15_i32 = arith.constant 15 : i32
    %36 = vector.broadcast %c15_i32 : i32 to vector<128x128xi32>
    %37 = arith.cmpi ne, %35, %36 : vector<128x128xi32>
    %c1_i32_11 = arith.constant 1 : i32
    %38 = tpu.dynamic_rotate %0 by %c1_i32_11 dim 0 : vector<128x128xf32>, i32 -> vector<128x128xf32>
    %cst = arith.constant 0.000000e+00 : f32
    %39 = vector.broadcast %cst : f32 to vector<128x128xf32>
    %40 = arith.select %19, %38, %39 : vector<128x128xi1>, vector<128x128xf32>
    %c127_i32 = arith.constant 127 : i32
    %41 = tpu.dynamic_rotate %0 by %c127_i32 dim 0 : vector<128x128xf32>, i32 -> vector<128x128xf32>
    %cst_12 = arith.constant 0.000000e+00 : f32
    %42 = vector.broadcast %cst_12 : f32 to vector<128x128xf32>
    %43 = arith.select %37, %41, %42 : vector<128x128xi1>, vector<128x128xf32>
    %44 = arith.truncf %40 : vector<128x128xf32> to vector<128x128xbf16>
    %c0_13 = arith.constant 0 : index
    %c0_14 = arith.constant 0 : index
    %c0_15 = arith.constant 0 : index
    %45 = vector.load %arg2[%c0_13, %c0_14, %c0_15] : memref<3x128x128xbf16, #tpu.memory_space<vmem>>, vector<1x128x128xbf16>
    %46 = vector.shape_cast %45 : vector<1x128x128xbf16> to vector<128x128xbf16>
    %cst_16 = arith.constant dense<0.000000e+00> : vector<128x128xf32>
    %47 = tpu.matmul %44, %46, %cst_16 {dimension_numbers = #tpu.dot_dimension_numbers<[1], [0], [0], [1], [0, 0, 1, 1], [], []>} : vector<128x128xbf16>, vector<128x128xbf16>, vector<128x128xf32> -> vector<128x128xf32>
    %48 = arith.truncf %0 : vector<128x128xf32> to vector<128x128xbf16>
    %c1 = arith.constant 1 : index
    %c0_17 = arith.constant 0 : index
    %c0_18 = arith.constant 0 : index
    %49 = vector.load %arg2[%c1, %c0_17, %c0_18] : memref<3x128x128xbf16, #tpu.memory_space<vmem>>, vector<1x128x128xbf16>
    %50 = vector.shape_cast %49 : vector<1x128x128xbf16> to vector<128x128xbf16>
    %cst_19 = arith.constant dense<0.000000e+00> : vector<128x128xf32>
    %51 = tpu.matmul %48, %50, %cst_19 {dimension_numbers = #tpu.dot_dimension_numbers<[1], [0], [0], [1], [0, 0, 1, 1], [], []>} : vector<128x128xbf16>, vector<128x128xbf16>, vector<128x128xf32> -> vector<128x128xf32>
    %52 = arith.addf %47, %51 : vector<128x128xf32>
    %53 = arith.truncf %43 : vector<128x128xf32> to vector<128x128xbf16>
    %c2 = arith.constant 2 : index
    %c0_20 = arith.constant 0 : index
    %c0_21 = arith.constant 0 : index
    %54 = vector.load %arg2[%c2, %c0_20, %c0_21] : memref<3x128x128xbf16, #tpu.memory_space<vmem>>, vector<1x128x128xbf16>
    %55 = vector.shape_cast %54 : vector<1x128x128xbf16> to vector<128x128xbf16>
    %cst_22 = arith.constant dense<0.000000e+00> : vector<128x128xf32>
    %56 = tpu.matmul %53, %55, %cst_22 {dimension_numbers = #tpu.dot_dimension_numbers<[1], [0], [0], [1], [0, 0, 1, 1], [], []>} : vector<128x128xbf16>, vector<128x128xbf16>, vector<128x128xf32> -> vector<128x128xf32>
    %57 = arith.addf %52, %56 : vector<128x128xf32>
    %c0_23 = arith.constant 0 : index
    %c0_24 = arith.constant 0 : index
    %58 = vector.load %arg3[%c0_23, %c0_24] : memref<1x128xf32, #tpu.memory_space<vmem>>, vector<1x128xf32>
    %59 = vector.broadcast %58 : vector<1x128xf32> to vector<128x128xf32>
    %60 = arith.addf %57, %59 : vector<128x128xf32>
    %cst_25 = arith.constant 0.000000e+00 : f32
    %61 = vector.broadcast %cst_25 : f32 to vector<128x128xf32>
    %62 = arith.maximumf %60, %61 : vector<128x128xf32>
    %c1_i32_26 = arith.constant 1 : i32
    %63 = tpu.dynamic_rotate %62 by %c1_i32_26 dim 0 : vector<128x128xf32>, i32 -> vector<128x128xf32>
    %cst_27 = arith.constant 0.000000e+00 : f32
    %64 = vector.broadcast %cst_27 : f32 to vector<128x128xf32>
    %65 = arith.select %19, %63, %64 : vector<128x128xi1>, vector<128x128xf32>
    %c127_i32_28 = arith.constant 127 : i32
    %66 = tpu.dynamic_rotate %62 by %c127_i32_28 dim 0 : vector<128x128xf32>, i32 -> vector<128x128xf32>
    %cst_29 = arith.constant 0.000000e+00 : f32
    %67 = vector.broadcast %cst_29 : f32 to vector<128x128xf32>
    %68 = arith.select %37, %66, %67 : vector<128x128xi1>, vector<128x128xf32>
    %69 = arith.truncf %65 : vector<128x128xf32> to vector<128x128xbf16>
    %c0_30 = arith.constant 0 : index
    %c0_31 = arith.constant 0 : index
    %c0_32 = arith.constant 0 : index
    %70 = vector.load %arg4[%c0_30, %c0_31, %c0_32] : memref<3x128x128xbf16, #tpu.memory_space<vmem>>, vector<1x128x128xbf16>
    %71 = vector.shape_cast %70 : vector<1x128x128xbf16> to vector<128x128xbf16>
    %cst_33 = arith.constant dense<0.000000e+00> : vector<128x128xf32>
    %72 = tpu.matmul %69, %71, %cst_33 {dimension_numbers = #tpu.dot_dimension_numbers<[1], [0], [0], [1], [0, 0, 1, 1], [], []>} : vector<128x128xbf16>, vector<128x128xbf16>, vector<128x128xf32> -> vector<128x128xf32>
    %73 = arith.truncf %62 : vector<128x128xf32> to vector<128x128xbf16>
    %c1_34 = arith.constant 1 : index
    %c0_35 = arith.constant 0 : index
    %c0_36 = arith.constant 0 : index
    %74 = vector.load %arg4[%c1_34, %c0_35, %c0_36] : memref<3x128x128xbf16, #tpu.memory_space<vmem>>, vector<1x128x128xbf16>
    %75 = vector.shape_cast %74 : vector<1x128x128xbf16> to vector<128x128xbf16>
    %cst_37 = arith.constant dense<0.000000e+00> : vector<128x128xf32>
    %76 = tpu.matmul %73, %75, %cst_37 {dimension_numbers = #tpu.dot_dimension_numbers<[1], [0], [0], [1], [0, 0, 1, 1], [], []>} : vector<128x128xbf16>, vector<128x128xbf16>, vector<128x128xf32> -> vector<128x128xf32>
    %77 = arith.addf %72, %76 : vector<128x128xf32>
    %78 = arith.truncf %68 : vector<128x128xf32> to vector<128x128xbf16>
    %c2_38 = arith.constant 2 : index
    %c0_39 = arith.constant 0 : index
    %c0_40 = arith.constant 0 : index
    %79 = vector.load %arg4[%c2_38, %c0_39, %c0_40] : memref<3x128x128xbf16, #tpu.memory_space<vmem>>, vector<1x128x128xbf16>
    %80 = vector.shape_cast %79 : vector<1x128x128xbf16> to vector<128x128xbf16>
    %cst_41 = arith.constant dense<0.000000e+00> : vector<128x128xf32>
    %81 = tpu.matmul %78, %80, %cst_41 {dimension_numbers = #tpu.dot_dimension_numbers<[1], [0], [0], [1], [0, 0, 1, 1], [], []>} : vector<128x128xbf16>, vector<128x128xbf16>, vector<128x128xf32> -> vector<128x128xf32>
    %82 = arith.addf %77, %81 : vector<128x128xf32>
    %c0_42 = arith.constant 0 : index
    %c0_43 = arith.constant 0 : index
    %83 = vector.load %arg5[%c0_42, %c0_43] : memref<1x128xf32, #tpu.memory_space<vmem>>, vector<1x128xf32>
    %84 = vector.broadcast %83 : vector<1x128xf32> to vector<128x128xf32>
    %85 = arith.addf %82, %84 : vector<128x128xf32>
    %86 = arith.addf %85, %0 : vector<128x128xf32>
    %cst_44 = arith.constant 0.000000e+00 : f32
    %87 = vector.broadcast %cst_44 : f32 to vector<128x128xf32>
    %88 = arith.maximumf %86, %87 : vector<128x128xf32>
    %c0_45 = arith.constant 0 : index
    %c0_46 = arith.constant 0 : index
    %89 = vector.load %arg6[%c0_45, %c0_46] : memref<128x128xf32, #tpu.memory_space<vmem>>, vector<128x128xf32>
    tpu.vector_store %arg6[%c0_45, %c0_46], %88 {strides = array<i32>} : memref<128x128xf32, #tpu.memory_space<vmem>>, vector<128x128xf32>,
    return
  }
  func.func @transform_0(%arg0: i32) -> (i32, i32) {
    %c0_i32 = arith.constant 0 : i32
    %c0_i32_0 = arith.constant 0 : i32
    return %arg0, %c0_i32 : i32, i32
  }
  func.func @transform_1(%arg0: i32) -> (i32, i32, i32) {
    %c0_i32 = arith.constant 0 : i32
    %c0_i32_0 = arith.constant 0 : i32
    %c0_i32_1 = arith.constant 0 : i32
    %c0_i32_2 = arith.constant 0 : i32
    return %c0_i32, %c0_i32_0, %c0_i32_1 : i32, i32, i32
  }
  func.func @transform_2(%arg0: i32) -> (i32, i32) {
    %c0_i32 = arith.constant 0 : i32
    %c0_i32_0 = arith.constant 0 : i32
    %c0_i32_1 = arith.constant 0 : i32
    return %c0_i32, %c0_i32_0 : i32, i32
  }
  func.func @transform_3(%arg0: i32) -> (i32, i32, i32) {
    %c0_i32 = arith.constant 0 : i32
    %c0_i32_0 = arith.constant 0 : i32
    %c0_i32_1 = arith.constant 0 : i32
    %c0_i32_2 = arith.constant 0 : i32
    return %c0_i32, %c0_i32_0, %c0_i32_1 : i32, i32, i32
  }
  func.func @transform_4(%arg0: i32) -> (i32, i32) {
    %c0_i32 = arith.constant 0 : i32
    %c0_i32_0 = arith.constant 0 : i32
    %c0_i32_1 = arith.constant 0 : i32
    return %c0_i32, %c0_i32_0 : i32, i32
  }
  func.func @transform_5(%arg0: i32) -> (i32, i32) {
    %c0_i32 = arith.constant 0 : i32
    %c0_i32_0 = arith.constant 0 : i32
    return %arg0, %c0_i32 : i32, i32
  }
}

</mosaic_0001>

<bundles_post_ra>
// kernel: tpu_custom_call.1
= control target key start
LH: loop header
LB: loop body
LE: loop exit
PB: predicated region body
PF: predicated region fallthrough
CT: control target
= control target key end

     0   :  { %10 = vsyncpa [#allocation3], 0  ;;  %s3678_s0 = inlined_call_operand.hbm [shape: f32[256,128], index: 0, kind: input, shape index: {}]   ;;  %s3679_s1 = inlined_call_operand.hbm [shape: bf16[3,128,128], index: 1, kind: input, shape index: {}]   ;;  %s3680_s2 = inlined_call_operand.vmem [shape: f32[1,128], index: 2, kind: input, shape index: {}]   ;;  %s3681_s3 = inlined_call_operand.hbm [shape: bf16[3,128,128], index: 3, kind: input, shape index: {}]   ;;  %s3682_s4 = inlined_call_operand.vmem [shape: f32[1,128], index: 4, kind: input, shape index: {}]   ;;  %s3683_s5 = inlined_call_operand.hbm [shape: f32[256,128], index: 5, kind: output, shape index: {}]  }
   0x1   :  { %12 = vsyncpa [#allocation3 + $0x1], 0 }
   0x2   :  { %13 = vsyncpa [#allocation6], 0 }
   0x3   :  { %14 = vsyncpa [#allocation4], 0 }
   0x4   :  { %16 = vsyncpa [#allocation4 + $0x1], 0  ;;  %s2846_s18 = smov 0   ;;  %s2848_s19 = smov 0  }
   0x5   :  { %s2850_s20 = smov 0   ;;  %s2852_s21 = smov 0  }
   0x6 LB: > { %s2867_s22 = sadd.s32 4294967295, %s2803_s21   ;;  %s1992_s23 = sadd.s32 4294967294, %s2803_s21   ;;  %s2803_s21 = sphi %s2852_s21, %s3794_s21   ;;  %s2799_s20 = sphi %s2850_s20, %s3793_s20   ;;  %s2795_s19 = sphi %s2848_s19, %s3792_s19   ;;  %s2791_s18 = sphi %s2846_s18, %s3791_s18  }
   0x7   : > { %p42_p0 = scmp.ne.s32.totalorder %s2795_s19, %s2791_s18  ;;  %p3684_p1 = scmp.eq.s32.totalorder %s2867_s22, 0 }
   0x8   : > { %p156_p3 = scmp.eq.s32.totalorder %s1992_s23, 1  ;;  %p1993_p5 = scmp.ge.s32.totalorder %s2803_s21, 1 }
   0x9   : > { %p2876_p4 = por %p3684_p1, %p42_p0  ;;  %p163_p7 = scmp.lt.s32.totalorder %s2803_s21, 3 }
   0xa   : > { %p2881_p6 = por %p156_p3, %p42_p0  ;;  %s2805_s27 = smov [#allocation5]  }
   0xb   : > { %s3698_s24 = scalar_select %p2876_p4, 1, 0 }
   0xc   : > { %s3699_s25 = scalar_select %p2881_p6, 1, 0 }
   0xd   : > { %p2886_p8 = pnand %p1993_p5, %p163_p7  ;;  %s175_s28 = sshll.u32 %s2805_s27, 4  ;;  %s2890_s28 = int_to_ptr.vmem [resolvable:$true] %s175_s28 }
   0xe   : > { %s2806_s30 = smov [#allocation7]   ;;  %s2647_s9 = scalar_lea.hbm %s3679_s1, 3072 }
   0xf   : > { %p2522_p9 = pneg %p2886_p8  ;;  %s191_s6 = sshll.u32 %s2806_s30, 4  ;;  %s2901_s6 = int_to_ptr.vmem [resolvable:$true] %s191_s6 }
  0x10   : > { %p2648_p12 = scmp.ne.s32.totalorder %s3679_s1, %s2647_s9  ;;  %p2654_p5 = scmp.lt.u32.totalorder %s2647_s9, %s3679_s1 }
  0x11   : > { %p2897_p11 = pnand %p2522_p9, %p3684_p1 }
  0x13   : > { %p2649_p13 = pneg %p2897_p11 }
  0x15   : > { %p2650_p0 = pnand %p2649_p13, %p2648_p12 }
  0x17   : > { %p2651_p3 = pneg %p2650_p0 }
  0x19   : > { %p2656_p7 = pnand %p2654_p5, %p2651_p3 }
  0x1b   : > { %2659 = shalt.err (!%p2656_p7)
}
  0x1c   : > { %s2660_s14 = scalar_lea.vmem %s2890_s28, 3072  ;;  %p2668_p2 = scmp.lt.s32.totalorder %s2890_s28, %s2890_s28 }
  0x1d   : > { %p2661_p9 = scmp.ne.s32.totalorder %s2890_s28, %s2660_s14  ;;  %p2669_p12 = scmp.lt.s32.totalorder %s2660_s14, %s2660_s14 }
  0x1f   : > { %p2663_p10 = pnand %p2661_p9, %p2649_p13  ;;  %p2670_p0 = por %p2669_p12, %p2668_p2 }
  0x21   : > { %p2664_p1 = pneg %p2663_p10 }
  0x23   : > { %p2671_p6 = pnand %p2670_p0, %p2664_p1 }
  0x25   : > { %2674 = shalt.err (!%p2671_p6)
}
  0x26   : > { %s2807_s15 = smov 64   ;;  %s2808_s16 = smov 4  }
  0x27   : > { %2525 = dma.hbm_to_vmem [thread:$0]  (!%p2897_p11), %s3679_s1, 3072, %s2890_s28, [#allocation6], %s2807_s15, %s2807_s15, %s2808_s16  }
  0x28   : > { %s2675_s7 = scalar_lea.hbm %s3681_s3, 3072 }
  0x29   : > { %p2676_p2 = scmp.ne.s32.totalorder %s3681_s3, %s2675_s7  ;;  %p2682_p10 = scmp.lt.u32.totalorder %s2675_s7, %s3681_s3 }
  0x2b   : > { %p2678_p1 = pnand %p2676_p2, %p2649_p13 }
  0x2d   : > { %p2679_p6 = pneg %p2678_p1 }
  0x2f   : > { %p2684_p3 = pnand %p2682_p10, %p2679_p6 }
  0x31   : > { %2687 = shalt.err (!%p2684_p3)
}
  0x32   : > { %s2688_s28 = scalar_lea.vmem %s2901_s6, 3072  ;;  %p2696_p12 = scmp.lt.s32.totalorder %s2901_s6, %s2901_s6 }
  0x33   : > { %p2689_p5 = scmp.ne.s32.totalorder %s2901_s6, %s2688_s28  ;;  %p2697_p0 = scmp.lt.s32.totalorder %s2688_s28, %s2688_s28 }
  0x35   : > { %p2691_p7 = pnand %p2689_p5, %p2649_p13  ;;  %p2698_p2 = por %p2697_p0, %p2696_p12 }
  0x37   : > { %p2692_p9 = pneg %p2691_p7 }
  0x39   : > { %p2699_p1 = pnand %p2698_p2, %p2692_p9 }
  0x3b   : > { %2702 = shalt.err (!%p2699_p1)
}
  0x3c   : > { %2528 = dma.hbm_to_vmem [thread:$0]  (!%p2897_p11), %s3681_s3, 3072, %s2901_s6, [#allocation6], %s2807_s15, %s2807_s15, %s2808_s16  }
  0x3d   : > { %s2956_s14 = sadd.s32 1, %s2803_s21   ;;  %s29_s29 = sadd.s32 1, %s2799_s20 }
  0x3e   : > { %s26_s17 = ssub.s32 %s2803_s21, %s2956_s14  ;;  %p36_p13 = scmp.ne.s32.totalorder %s2799_s20, %s2795_s19 }
  0x3f   : > { %p27_p6 = scmp.eq.s32.totalorder %s26_s17, 0  ;;  %p37_p10 = scmp.eq.s32.totalorder %s2803_s21, 0 }
  0x40   : > { %p3702_p3 = scmp.eq.s32.totalorder %s2867_s22, 1  ;;  %p2539_p7 = scmp.lt.s32.totalorder %s2803_s21, 2 }
  0x41   : > { %s2972_s27 = scalar_select %p27_p6, %s2799_s20, %s29_s29  }
  0x42   : > { %p2966_p5 = por %p3702_p3, %p36_p13  ;;  %p38_p9 = por %p37_p10, %p36_p13 }
  0x43   : > { %s208_s30 = sand.u32 1, %s2799_s20   ;;  %s2156_s6 = sshll.u32 %s2803_s21, 11 }
  0x44   : > { %s3703_s23 = scalar_select %p2966_p5, 1, 0 }
  0x45   : > { %s1997_s7 = sshll.u32 %s208_s30, 7  ;;  %s2979_s8 = scalar_lea.hbm %s3678_s0, %s2156_s6 }
  0x46   : > { %s212_s9 = scalar_lea.vmem [#allocation2], %s1997_s7  ;;  %p2983_p11 = pnand %p2539_p7, %p38_p9 }
  0x47   : > { %s219_s10 = sshll.u32 %s212_s9, 4  ;;  %s2987_s28 = scalar_lea.sflag [#allocation3], %s208_s30  ;;  %s2981_s10 = int_to_ptr.vmem [resolvable:$true] %s219_s10 }
  0x48   : > { %s2703_s12 = scalar_lea.hbm %s2979_s8, 2048  ;;  %p2705_p0 = pneg %p2983_p11 }
  0x49   : > { %p2704_p12 = scmp.ne.s32.totalorder %s2979_s8, %s2703_s12  ;;  %s2708_s17 = scalar_lea.hbm %s3678_s0, 4096 }
  0x4a   : > { %p2709_p13 = scmp.lt.u32.totalorder %s2979_s8, %s3678_s0  ;;  %p2710_p6 = scmp.lt.u32.totalorder %s2708_s17, %s2703_s12 }
  0x4b   : > { %p2706_p2 = pnand %p2705_p0, %p2704_p12  ;;  %p2712_p3 = scmp.lt.u32.totalorder %s2703_s12, %s2979_s8 }
  0x4c   : > { %p2711_p10 = por %p2710_p6, %p2709_p13 }
  0x4d   : > { %p2707_p1 = pneg %p2706_p2 }
  0x4e   : > { %p2713_p7 = por %p2712_p3, %p2711_p10 }
  0x50   : > { %p2714_p9 = pnand %p2713_p7, %p2707_p1 }
  0x52   : > { %2717 = shalt.err (!%p2714_p9)
}
  0x53   : > { %s2718_s30 = scalar_lea.vmem %s2981_s10, 2048  ;;  %s2809_s15 = smov [#allocation2]  }
  0x54   : > { %p2719_p12 = scmp.ne.s32.totalorder %s2981_s10, %s2718_s30  ;;  %s2723_s16 = sshll.u32 %s2809_s15, 4  ;;  %s2724_s16 = int_to_ptr.vmem [resolvable:$false] %s2723_s16 }
  0x55   : > { %s2725_s9 = scalar_lea.vmem %s2724_s16, 4096  ;;  %p2726_p4 = scmp.lt.s32.totalorder %s2981_s10, %s2724_s16 }
  0x56   : > { %p2721_p2 = pnand %p2719_p12, %p2705_p0  ;;  %p2727_p13 = scmp.lt.s32.totalorder %s2725_s9, %s2718_s30 }
  0x58   : > { %p2722_p5 = pneg %p2721_p2  ;;  %p2728_p6 = por %p2727_p13, %p2726_p4 }
  0x5a   : > { %p2729_p10 = pnand %p2728_p6, %p2722_p5 }
  0x5c   : > { %2732 = shalt.err (!%p2729_p10)
}
  0x5d   : > { %s2810_s12 = smov 128   ;;  %s2811_s13 = smov 8  }
  0x5e   : > { %2532 = dma.hbm_to_vmem [thread:$0]  (!%p2983_p11), %s2979_s8, 2048, %s2981_s10, %s2987_s28, %s2810_s12, %s2810_s12, %s2811_s13  }
  0x5f   : > { %231 = sbr.rel (%p2886_p8) target bundleno = 749 (0x2ed), region = 40  ;;  %s3018_s29 = sand.u32 (!%p2886_p8), 1, %s2795_s19  }
  0x60   : > { %s2001_s17 = sshll.u32 (!%p2886_p8), %s3018_s29, 7  ;;  %s234_s7 = scalar_lea.sflag (!%p2886_p8), [#allocation3], %s3018_s29 }
  0x61   : > { %s3024_s6 = scalar_lea.vmem (!%p2886_p8), [#allocation2], %s2001_s17  ;;  %p3705_p4 = scmp.ne.s32.totalorder (!%p2886_p8), %s3698_s24, 0 }
  0x66   : > { %2778 = dma.done.wait (%p3705_p4), %s234_s7, 2048  }
  0x67   : > { %2780 = vsyncadd (%p3705_p4), %s234_s7, 4294965248  ;;  %p3706_p5 = scmp.eq.s32.totalorder %s2867_s22, 0 }
  0x69   : > { %2782 = dma.done.wait (%p3706_p5), [#allocation6], 6144   ;;  %p3707_p8 = pmov %p3706_p5 }
  0x6a   : > { %v2584_v0 = vld [vmem:[#allocation5 + $0x40] sm:$0xff]   ;;  %v2585_v1 = vld [vmem:[#allocation5 + $0x48] sm:$0xff]   ;;  %v2586_v2 = vld [vmem:[#allocation5 + $0x50] sm:$0xff]   ;;  %v291_v16 = vlaneseq  ;;  %vm3691_vm2 = vmmov 1   ;;  %s3585_s11 = scalar_lea.vmem [#allocation8], %s2001_s17  ;;  %s2157_s28 = sshll.u32 %s2867_s22, 11 }
  0x6b   : > { %2784 = vsyncadd (%p3707_p8), [#allocation6], 4294961152  ;;  %2254 = vmatprep.subr.bf16.mxu0 %v2584_v0  ;;  %v2587_v3 = vld [vmem:[#allocation5 + $0x58] sm:$0xff]   ;;  %v3035_v4 = vld [vmem:[%s3024_s6] sm:$0xff]  ;;  %s1900_s30 = sshll.u32 %s3585_s11, 4  ;;  %s3629_s9 = scalar_lea.hbm %s3683_s5, %s2157_s28  ;;  %s3631_s30 = int_to_ptr.vmem [resolvable:$true] %s1900_s30 }
  0x6c   : > { %2255 = vmatpush3.bf16.msra.mxu0 %v2584_v0  ;;  %v3038_v5 = vld [vmem:[%s3024_s6 + $0x8] sm:$0xff]  ;;  %v2588_v7 = vld [vmem:[#allocation5 + $0x60] sm:$0xff]   ;;  %v2590_v9 = vld [vmem:[#allocation5 + $0x70] sm:$0xff]   ;;  %v3064_v23 = vshrl.u32 %v291_v16, 7  ;;  %v532_v32 = vrot.slane %v3035_v4, 7  ;;  %s1887_s22 = scalar_lea.sflag [#allocation4], %s3018_s29 }
  0x6d   : > { %2256 = vmatprep.subr.bf16.mxu0 %v2585_v1  ;;  %v654_v6 = vpack.c.bf16 %v3038_v5, %v3035_v4  ;;  %v2589_v8 = vld [vmem:[#allocation5 + $0x68] sm:$0xff]   ;;  %v2591_v10 = vld [vmem:[#allocation5 + $0x78] sm:$0xff]   ;;  %v3043_v11 = vld [vmem:[%s3024_s6 + $0x10] sm:$0xff]  ;;  %v533_v35 = vrot.slane %v3038_v5, 7  ;;  %s2733_s12 = scalar_lea.vmem %s3631_s30, 2048  ;;  %p3788_p0 = scmp.ne.s32.totalorder %s3703_s23, 0 }
  0x6e   : > { %v3046_v12 = vld [vmem:[%s3024_s6 + $0x18] sm:$0xff]  ;;  %v2592_v13 = vld [vmem:[#allocation5] sm:$0xff]   ;;  %v3052_v15 = vld [vmem:[%s3024_s6 + $0x28] sm:$0xff]  ;;  %v312_v29 = vand.u32 15, %v3064_v23  ;;  %v3076_v30 = vadd.s32 16, %v3064_v23  ;;  %vm3687_vm0 = vcmp.lt.s32.totalorder %v3064_v23, 1  ;;  %p2734_p11 = scmp.ne.s32.totalorder %s3631_s30, %s2733_s12 }
  0x6f   : > { %2270 = vmatprep.mubr.bf16.mxu0 %v654_v6  ;;  %v3049_v14 = vld [vmem:[%s3024_s6 + $0x20] sm:$0xff]  ;;  %v655_v17 = vpack.c.bf16 %v3046_v12, %v3043_v11  ;;  %v2593_v19 = vld [vmem:[#allocation5 + $0x8] sm:$0xff]   ;;  %v3059_v20 = vld [vmem:[%s3024_s6 + $0x30] sm:$0xff]  ;;  %v563_v51 = vsel %vm3687_vm0, %v532_v32, %v533_v35  ;;  %v296_v53 = vadd.s32 32, %v3064_v23  ;;  %v534_v55 = vrot.slane %v3043_v11, 7  ;;  %s2813_s13 = smov [#allocation8]  }
  0x70   : > { %2257 = vmatpush3.bf16.msra.mxu0 %v2585_v1  ;;  %v656_v18 = vpack.c.bf16 %v3052_v15, %v3049_v14  ;;  %v3062_v21 = vld [vmem:[%s3024_s6 + $0x38] sm:$0xff]  ;;  %v2608_v22 = vld [vmem:[#allocation7 + $0x40] sm:$0xff]   ;;  %v2594_v24 = vld [vmem:[#allocation5 + $0x10] sm:$0xff]   ;;  %vm500_vm1 = vcmp.ne.s32.totalorder %v312_v29, 0  ;;  %v535_v56 = vrot.slane %v3046_v12, 7  ;;  %v536_v58 = vrot.slane %v3049_v14, 7  ;;  %p2735_p1 = pnand %p2734_p11, %p3788_p0 }
  0x71   : > { %2258 = vmatprep.subr.bf16.mxu0 %v2586_v2  ;;  %v3067_v25 = vld [vmem:[%s3024_s6 + $0x40] sm:$0xff]  ;;  %v2609_v26 = vld [vmem:[#allocation7 + $0x48] sm:$0xff]   ;;  %2350 = vmatprep.subr.bf16.mxu1 %v2608_v22  ;;  %v657_v28 = vpack.c.bf16 %v3062_v21, %v3059_v20  ;;  %v2610_v31 = vld [vmem:[#allocation7 + $0x50] sm:$0xff]   ;;  %v537_v59 = vrot.slane %v3052_v15, 7  ;;  %v326_v62 = vand.u32 15, %v3076_v30  ;;  %v340_v63 = vand.u32 15, %v296_v53 }
  0x72   : > { %v3070_v27 = vld [vmem:[%s3024_s6 + $0x48] sm:$0xff]  ;;  %2351 = vmatpush3.bf16.msra.mxu1 %v2608_v22  ;;  %v2595_v33 = vld [vmem:[#allocation5 + $0x18] sm:$0xff]   ;;  %v3087_v37 = vld [vmem:[%s3024_s6 + $0x50] sm:$0xff]  ;;  %v561_v0 = vsel %vm3687_vm0, %v534_v55, %v535_v56  ;;  %v562_v1 = vsel %vm3687_vm0, %v533_v35, %v534_v55  ;;  %v560_v6 = vsel %vm3687_vm0, %v535_v56, %v536_v58  ;;  %v304_v35 = vadd.s32 96, %v3064_v23  ;;  %p2736_p3 = pneg %p2735_p1  ;;  %s2737_s17 = sshll.u32 %s2813_s13, 4  ;;  %s2738_s17 = int_to_ptr.vmem [resolvable:$false] %s2737_s17 }
  0x73   : > { %2352 = vmatprep.subr.bf16.mxu1 %v2609_v26  ;;  %v658_v34 = vpack.c.bf16 %v3070_v27, %v3067_v25  ;;  %v3083_v36 = vld [vmem:[%s3024_s6 + $0x78] sm:$0xff]  ;;  %v2596_v41 = vld [vmem:[#allocation5 + $0x20] sm:$0xff]   ;;  %v3097_v43 = vld [vmem:[%s3024_s6 + $0x68] sm:$0xff]  ;;  %vm502_vm4 = vcmp.ne.s32.totalorder %v326_v62, 0  ;;  %vm504_vm5 = vcmp.ne.s32.totalorder %v340_v63, 0  ;;  %s2739_s7 = scalar_lea.vmem %s2738_s17, 4096  ;;  %p2740_p7 = scmp.lt.s32.totalorder %s3631_s30, %s2738_s17 }
  0x74   : > { %2259 = vmatpush3.bf16.msra.mxu0 %v2586_v2  ;;  %v3090_v38 = vld [vmem:[%s3024_s6 + $0x58] sm:$0xff]  ;;  %v547_v39 = vrot.slane %v3083_v36, 7  ;;  %v3094_v42 = vld [vmem:[%s3024_s6 + $0x60] sm:$0xff]  ;;  %v2597_v46 = vld [vmem:[#allocation5 + $0x28] sm:$0xff]   ;;  %v396_v53 = vand.u32 15, %v304_v35  ;;  %p2741_p9 = scmp.lt.s32.totalorder %s2739_s7, %s2733_s12 }
  0x75   : > { %2260 = vmatprep.subr.bf16.mxu0 %v2587_v3  ;;  %v2611_v40 = vld [vmem:[#allocation7 + $0x58] sm:$0xff]   ;;  %v2612_v44 = vld [vmem:[#allocation7 + $0x60] sm:$0xff]   ;;  %v659_v45 = vpack.c.bf16 %v3090_v38, %v3087_v37  ;;  %v660_v47 = vpack.c.bf16 %v3097_v43, %v3094_v42  ;;  %v2613_v48 = vld [vmem:[#allocation7 + $0x68] sm:$0xff]  }
  0x76   : > { %2353 = vmatpush3.bf16.msra.mxu1 %v2609_v26  ;;  %v3104_v49 = vld [vmem:[%s3024_s6 + $0x70] sm:$0xff]  ;;  %v564_v52 = vsel %vm3687_vm0, %v547_v39, %v532_v32  ;;  %v2599_v60 = vld [vmem:[#allocation5 + $0x38] sm:$0xff]   ;;  %vm3120_vm3 = vmpackc.low %vm3691_vm2, %vm500_vm1  ;;  %vm512_vm13 = vcmp.ne.s32.totalorder %v396_v53, 0  ;;  %vm3688_vm1 = vcmp.lt.s32.totalorder %v3064_v23, 7  ;;  %v590_v53 = vrot.slane %v3070_v27, 1  ;;  %p2742_p12 = por %p2741_p9, %p2740_p7 }
  0x77   : > { %2354 = vmatprep.subr.bf16.mxu1 %v2610_v31  ;;  %v2598_v50 = vld [vmem:[#allocation5 + $0x30] sm:$0xff]   ;;  %v661_v54 = vpack.c.bf16 %v3083_v36, %v3104_v49  ;;  %v2022_v57 = vpack.c.bf16 %v563_v51, %v564_v52  ;;  %v2600_v2 = vld [vmem:[#allocation5 + $0x80] sm:$0xff]   ;;  %vm3140_vm6 = vmpackc.low %vm3691_vm2, %vm502_vm4  ;;  %v546_v63 = vrot.slane %v3104_v49, 7 }
  0x78   : > { %2261 = vmatpush3.bf16.msra.mxu0 %v2587_v3  ;;  %v559_v3 = vsel %vm3687_vm0, %v536_v58, %v537_v59  ;;  %v2601_v22 = vld [vmem:[#allocation5 + $0x88] sm:$0xff]   ;;  %vm3147_vm7 = vmpackc.low %vm3691_vm2, %vm504_vm5  ;;  %v2604_v56 = vld [vmem:[#allocation5 + $0xa0] sm:$0xff]   ;;  %p2743_p2 = pnand %p2742_p12, %p2736_p3 }
  0x79   : > { %2262 = vmatprep.subr.bf16.mxu0 %v2588_v7  ;;  %vm3203_vm15 = vmpackc.low %vm3691_vm2, %vm512_vm13  ;;  %v2628_v16 = vld [vmem:[#allocation7 + $0xa0] sm:$0xff]   ;;  %v2631_v51 = vld [vmem:[#allocation7 + $0xb8] sm:$0xff]  }
  0x7a   : > { %2355 = vmatpush3.bf16.msra.mxu1 %v2610_v31  ;;  %v2602_v31 = vld [vmem:[#allocation5 + $0x90] sm:$0xff]  }
  0x7b   : > { %2356 = vmatprep.subr.bf16.mxu1 %v2611_v40 }
  0x7c   : > { %2263 = vmatpush3.bf16.msra.mxu0 %v2588_v7  ;;  %v298_v7 = vadd.s32 48, %v3064_v23 }
  0x7d   : > { %2264 = vmatprep.subr.bf16.mxu0 %v2589_v8 }
  0x7e   : > { %2357 = vmatpush3.bf16.msra.mxu1 %v2611_v40  ;;  %v354_v26 = vand.u32 15, %v298_v7  ;;  %v2605_v7 = vld [vmem:[#allocation5 + $0xa8] sm:$0xff]  }
  0x7f   : > { %2358 = vmatprep.subr.bf16.mxu1 %v2612_v44 }
  0x80   : > { %2265 = vmatpush3.bf16.msra.mxu0 %v2589_v8  ;;  %v300_v8 = vadd.s32 64, %v3064_v23  ;;  %vm506_vm8 = vcmp.ne.s32.totalorder %v354_v26, 0  ;;  %v584_v26 = vrot.slane %v3046_v12, 1 }
  0x81   : > { %2266 = vmatprep.subr.bf16.mxu0 %v2590_v9  ;;  %vm3168_vm10 = vmpackc.low %vm3691_vm2, %vm506_vm8 }
  0x82   : > { %2359 = vmatpush3.bf16.msra.mxu1 %v2612_v44  ;;  %v543_v44 = vrot.slane %v3090_v38, 7 }
  0x83   : > { %2360 = vmatprep.subr.bf16.mxu1 %v2613_v48 }
  0x84   : > { %2267 = vmatpush3.bf16.msra.mxu0 %v2590_v9  ;;  %v2025_v9 = vpack.c.bf16 %v561_v0, %v562_v1 }
  0x85   : > { %2268 = vmatprep.subr.bf16.mxu0 %v2591_v10 }
  0x86   : > { %2361 = vmatpush3.bf16.msra.mxu1 %v2613_v48  ;;  %v545_v48 = vrot.slane %v3097_v43, 7 }
  0x88   : > { %2269 = vmatpush3.bf16.msra.mxu0 %v2591_v10  ;;  %v538_v10 = vrot.slane %v3059_v20, 7 }
  0x89   : > { %2286 = vmatprep.subr.bf16.mxu0 %v2592_v13 }
  0x8a   : > { %v558_v30 = vsel %vm3687_vm0, %v537_v59, %v538_v10  ;;  %v306_v59 = vadd.s32 112, %v3064_v23 }
  0x8b   : > { %2271 = vmatmul.mubr.bf16.vlgmr.msra.gmra.mrb[0].mxu0 %v655_v17  ;;  %v2028_v17 = vpack.c.bf16 %v559_v3, %v560_v6  ;;  %v582_v3 = vrot.slane %v3038_v5, 1  ;;  %v583_v6 = vrot.slane %v3043_v11, 1  ;;  %v549_v5 = vsel %vm3687_vm0, %v546_v63, %v547_v39 }
  0x8c   : > { %2287 = vmatpush3.bf16.msra.mxu0 %v2592_v13  ;;  %2274 = vmatprep.mubr.bf16.mxu0 %v656_v18  ;;  %v539_v13 = vrot.slane %v3062_v21, 7  ;;  %v540_v18 = vrot.slane %v3067_v25, 7  ;;  %v550_v11 = vsel %vm3687_vm0, %v545_v48, %v546_v63  ;;  %v593_v63 = vrot.slane %v3094_v42, 1 }
  0x8d   : > { %2288 = vmatprep.subr.bf16.mxu0 %v2593_v19  ;;  %v2043_v39 = vpack.c.bf16 %v549_v5, %v550_v11  ;;  %v610_v35 = vsel %vm3688_vm1, %v583_v6, %v584_v26 }
  0x8e   : > { %v557_v29 = vsel %vm3687_vm0, %v538_v10, %v539_v13 }
  0x8f   : > { %v2031_v40 = vpack.c.bf16 %v557_v29, %v558_v30 }
  0x90   : > { %2289 = vmatpush3.bf16.msra.mxu0 %v2593_v19  ;;  %v541_v19 = vrot.slane %v3070_v27, 7 }
  0x91   : > { %2290 = vmatprep.subr.bf16.mxu0 %v2594_v24 }
  0x92   : > { %v555_v32 = vsel %vm3687_vm0, %v540_v18, %v541_v19 }
  0x93   : > { %2275 = vmatmul.mubr.bf16.gmra.mrb[4].mxu0 %v657_v28  ;;  %v368_v28 = vand.u32 15, %v300_v8 }
  0x94   : > { %2291 = vmatpush3.bf16.msra.mxu0 %v2594_v24  ;;  %2278 = vmatprep.mubr.bf16.mxu0 %v658_v34  ;;  %v302_v34 = vadd.s32 80, %v3064_v23  ;;  %v2629_v24 = vld [vmem:[#allocation7 + $0xa8] sm:$0xff]  }
  0x95   : > { %2292 = vmatprep.subr.bf16.mxu0 %v2595_v33  ;;  %vm508_vm9 = vcmp.ne.s32.totalorder %v368_v28, 0  ;;  %v585_v28 = vrot.slane %v3049_v14, 1 }
  0x96   : > { %vm3175_vm11 = vmpackc.low %vm3691_vm2, %vm508_vm9  ;;  %v382_v52 = vand.u32 15, %v302_v34  ;;  %v3724_v34 = vmov 0 }
  0x98   : > { %2293 = vmatpush3.bf16.msra.mxu0 %v2595_v33  ;;  %v556_v33 = vsel %vm3687_vm0, %v539_v13, %v540_v18  ;;  %vm510_vm12 = vcmp.ne.s32.totalorder %v382_v52, 0  ;;  %v2606_v13 = vld [vmem:[#allocation5 + $0xb0] sm:$0xff]  }
  0x99   : > { %2294 = vmatprep.subr.bf16.mxu0 %v2596_v41  ;;  %vm3195_vm14 = vmpackc.low %vm3691_vm2, %vm510_vm12 }
  0x9b   : > { %2279 = vmatmul.mubr.bf16.gmra.mrb[8].mxu0 %v659_v45  ;;  %v2630_v45 = vld [vmem:[#allocation7 + $0xb0] sm:$0xff]  }
  0x9c   : > { %2295 = vmatpush3.bf16.msra.mxu0 %v2596_v41  ;;  %2282 = vmatprep.mubr.bf16.mxu0 %v660_v47  ;;  %v542_v41 = vrot.slane %v3087_v37, 7  ;;  %v544_v47 = vrot.slane %v3094_v42, 7 }
  0x9d   : > { %2296 = vmatprep.subr.bf16.mxu0 %v2597_v46 }
  0x9e   : > { %v554_v55 = vsel %vm3687_vm0, %v541_v19, %v542_v41  ;;  %v552_v58 = vsel %vm3687_vm0, %v543_v44, %v544_v47  ;;  %v295_v19 = vadd.s32 24, %v3064_v23 }
  0xa0   : > { %2297 = vmatpush3.bf16.msra.mxu0 %v2597_v46  ;;  %v2034_v46 = vpack.c.bf16 %v555_v32, %v556_v33  ;;  %v587_v32 = vrot.slane %v3059_v20, 1  ;;  %v2607_v33 = vld [vmem:[#allocation5 + $0xb8] sm:$0xff]   ;;  %v333_v12 = vand.u32 15, %v295_v19 }
  0xa1   : > { %2298 = vmatprep.subr.bf16.mxu0 %v2598_v50 }
  0xa2   : > { %vm519_vm12 = vcmp.ne.s32.totalorder %v333_v12, 15 }
  0xa3   : > { %2283 = vmatmul.mubr.bf16.gmra.mrb[12].mxu0 %v661_v54  ;;  %v553_v54 = vsel %vm3687_vm0, %v542_v41, %v543_v44  ;;  %v299_v41 = vadd.s32 56, %v3064_v23  ;;  %v301_v44 = vadd.s32 72, %v3064_v23 }
  0xa4   : > { %2299 = vmatpush3.bf16.msra.mxu0 %v2598_v50  ;;  %2302 = vmatprep.mubr.msk.bf16.mxu0 %vm3120_vm3, %v2022_v57  ;;  %v2603_v50 = vld [vmem:[#allocation5 + $0x98] sm:$0xff]   ;;  %v551_v57 = vsel %vm3687_vm0, %v544_v47, %v545_v48  ;;  %v2037_v62 = vpack.c.bf16 %v553_v54, %v554_v55  ;;  %v588_v47 = vrot.slane %v3062_v21, 1  ;;  %v589_v48 = vrot.slane %v3067_v25, 1 }
  0xa5   : > { %2300 = vmatprep.subr.bf16.mxu0 %v2599_v60  ;;  %v2040_v1 = vpack.c.bf16 %v551_v57, %v552_v58  ;;  %v591_v54 = vrot.slane %v3087_v37, 1  ;;  %v3728_v55 = vmov 0  ;;  %v375_v21 = vand.u32 15, %v301_v44 }
  0xa6   : > { %v605_v25 = vsel %vm3688_vm1, %v588_v47, %v589_v48  ;;  %v606_v27 = vsel %vm3688_vm1, %v587_v32, %v588_v47  ;;  %v604_v57 = vsel %vm3688_vm1, %v589_v48, %v590_v53  ;;  %v303_v58 = vadd.s32 88, %v3064_v23 }
  0xa7   : > { %v603_v37 = vsel %vm3688_vm1, %v590_v53, %v591_v54 }
  0xa8   : > { %2301 = vmatpush3.bf16.msra.mxu0 %v2599_v60  ;;  %v293_v60 = vadd.s32 8, %v3064_v23 }
  0xa9   : > { %2318 = vmatprep.subr.bf16.mxu0 %v2600_v2 }
  0xaa   : > { %v319_v10 = vand.u32 15, %v293_v60  ;;  %v2063_v60 = vpack.c.bf16 %v605_v25, %v606_v27 }
  0xab   : > { %2303 = vmatmul.mubr.msk.bf16.vlgmr.msra.gmra.mrb[0].mxu0 %vm3140_vm6, %v2025_v9  ;;  %v410_v9 = vand.u32 15, %v306_v59  ;;  %v305_v59 = vadd.s32 104, %v3064_v23 }
  0xac   : > { %2319 = vmatpush3.bf16.msra.mxu0 %v2600_v2  ;;  %2306 = vmatprep.mubr.msk.bf16.mxu0 %vm3147_vm7, %v2028_v17  ;;  %v581_v2 = vrot.slane %v3035_v4, 1  ;;  %v611_v17 = vsel %vm3688_vm1, %v582_v3, %v583_v6  ;;  %vm517_vm5 = vcmp.ne.s32.totalorder %v319_v10, 15  ;;  %v594_v6 = vrot.slane %v3097_v43, 1  ;;  %v2616_v4 = vld [vmem:[#allocation7] sm:$0xff]  }
  0xad   : > { %2320 = vmatprep.subr.bf16.mxu0 %v2601_v22  ;;  %vm514_vm4 = vcmp.ne.s32.totalorder %v410_v9, 0  ;;  %vm3236_vm9 = vmpackc.low %vm517_vm5, %vm3691_vm2  ;;  %v3732_v9 = vmov 0  ;;  %v389_v10 = vand.u32 15, %v303_v58  ;;  %v403_v5 = vand.u32 15, %v305_v59 }
  0xae   : > { %v612_v18 = vsel %vm3688_vm1, %v581_v2, %v582_v3  ;;  %vm3229_vm8 = vmpackc.low %vm3691_vm2, %vm514_vm4  ;;  %v3725_v34 = vsel %vm3236_vm9, 4294967295, %v3724_v34  ;;  %v2066_v3 = vpack.c.bf16 %v603_v37, %v604_v57 }
  0xaf   : > { %v2054_v30 = vpack.c.bf16 %v611_v17, %v612_v18  ;;  %vm3257_vm4 = vmpackc.low %vm519_vm12, %vm3691_vm2  ;;  %v596_v18 = vrot.slane %v3083_v36, 1 }
  0xb0   : > { %2321 = vmatpush3.bf16.msra.mxu0 %v2601_v22  ;;  %v297_v22 = vadd.s32 40, %v3064_v23 }
  0xb1   : > { %2322 = vmatprep.subr.bf16.mxu0 %v2602_v31 }
  0xb2   : > { %v347_v14 = vand.u32 15, %v297_v22 }
  0xb3   : > { %2307 = vmatmul.mubr.msk.bf16.gmra.mrb[4].mxu0 %vm3168_vm10, %v2031_v40 }
  0xb4   : > { %2323 = vmatpush3.bf16.msra.mxu0 %v2602_v31  ;;  %2310 = vmatprep.mubr.msk.bf16.mxu0 %vm3175_vm11, %v2034_v46  ;;  %v586_v31 = vrot.slane %v3052_v15, 1  ;;  %v609_v15 = vsel %vm3688_vm1, %v584_v26, %v585_v28  ;;  %vm521_vm13 = vcmp.ne.s32.totalorder %v347_v14, 15 }
  0xb5   : > { %2324 = vmatprep.subr.bf16.mxu0 %v2603_v50  ;;  %v2057_v46 = vpack.c.bf16 %v609_v15, %v610_v35  ;;  %vm3264_vm5 = vmpackc.low %vm521_vm13, %vm3691_vm2  ;;  %vm525_vm13 = vcmp.ne.s32.totalorder %v375_v21, 15 }
  0xb6   : > { %v607_v20 = vsel %vm3688_vm1, %v586_v31, %v587_v32  ;;  %v608_v40 = vsel %vm3688_vm1, %v585_v28, %v586_v31  ;;  %v3729_v55 = vsel %vm3264_vm5, 4294967295, %v3728_v55  ;;  %vm3292_vm1 = vmpackc.low %vm525_vm13, %vm3691_vm2  ;;  %v3744_v31 = vmov 0  ;;  %v2614_v32 = vld [vmem:[#allocation7 + $0x70] sm:$0xff]  }
  0xb7   : > { %v2060_v52 = vpack.c.bf16 %v607_v20, %v608_v40  ;;  %v3733_v9 = vsel %vm3292_vm1, 4294967295, %v3732_v9  ;;  %2362 = vmatprep.subr.bf16.mxu1 %v2614_v32 }
  0xb8   : > { %2325 = vmatpush3.bf16.msra.mxu0 %v2603_v50  ;;  %v3726_v50 = vmov 0  ;;  %2363 = vmatpush3.bf16.msra.mxu1 %v2614_v32  ;;  %v2618_v32 = vld [vmem:[#allocation7 + $0x10] sm:$0xff]  }
  0xb9   : > { %2326 = vmatprep.subr.bf16.mxu0 %v2604_v56  ;;  %v3727_v50 = vsel %vm3257_vm4, 4294967295, %v3726_v50 }
  0xbb   : > { %2311 = vmatmul.mubr.msk.bf16.gmra.mrb[8].mxu0 %vm3195_vm14, %v2037_v62  ;;  %v592_v62 = vrot.slane %v3090_v38, 1 }
  0xbc   : > { %2327 = vmatpush3.bf16.msra.mxu0 %v2604_v56  ;;  %2314 = vmatprep.mubr.msk.bf16.mxu0 %vm3203_vm15, %v2040_v1  ;;  %v361_v56 = vand.u32 15, %v299_v41  ;;  %v3730_v1 = vmov 0 }
  0xbd   : > { %2328 = vmatprep.subr.bf16.mxu0 %v2605_v7 }
  0xbe   : > { %vm523_vm12 = vcmp.ne.s32.totalorder %v361_v56, 15 }
  0xbf   : > { %vm3285_vm0 = vmpackc.low %vm523_vm12, %vm3691_vm2  ;;  %vm3734_vm12 = vcmp.lt.s32.totalorder %v3064_v23, 7 }
  0xc0   : > { %2329 = vmatpush3.bf16.msra.mxu0 %v2605_v7  ;;  %v3731_v1 = vsel %vm3285_vm0, 4294967295, %v3730_v1  ;;  %v595_v7 = vrot.slane %v3104_v49, 1  ;;  %v601_v38 = vsel %vm3734_vm12, %v592_v62, %v593_v63 }
  0xc1   : > { %2330 = vmatprep.subr.bf16.mxu0 %v2606_v13 }
  0xc3   : > { %2315 = vmatmul.mubr.msk.bf16.gmra.mrb[12].mxu0 %vm3229_vm8, %v2043_v39  ;;  %v2632_v39 = vld [vmem:[%s3024_s6 + $0x10] sm:$0xff] }
  0xc4   : > { %2331 = vmatpush3.bf16.msra.mxu0 %v2606_v13  ;;  %2334 = vmatprep.mubr.msk.bf16.mxu0 %vm3236_vm9, %v2054_v30  ;;  %v307_v13 = vadd.s32 120, %v3064_v23  ;;  %vm529_vm9 = vcmp.ne.s32.totalorder %v403_v5, 15 }
  0xc5   : > { %2332 = vmatprep.subr.bf16.mxu0 %v2607_v33 }
  0xc6   : > { %v417_v26 = vand.u32 15, %v307_v13 }
  0xc8   : > { %2333 = vmatpush3.bf16.msra.mxu0 %v2607_v33  ;;  %v2615_v33 = vld [vmem:[#allocation7 + $0x78] sm:$0xff]  }
  0xc9   : > { %2364 = vmatprep.subr.bf16.mxu1 %v2615_v33 }
  0xca   : > { %2365 = vmatpush3.bf16.msra.mxu1 %v2615_v33 }
  0xcb   : > { %2335 = vmatmul.mubr.msk.bf16.vlgmr.msra.gmra.mrb[0].mxu0 %vm3257_vm4, %v2057_v46  ;;  %vm527_vm4 = vcmp.ne.s32.totalorder %v389_v10, 15  ;;  %2382 = vmatprep.subr.bf16.mxu1 %v2616_v4 }
  0xcc   : > { %2338 = vmatprep.mubr.msk.bf16.mxu0 %vm3264_vm5, %v2060_v52  ;;  %vm3735_vm5 = vmmov %vm3734_vm12  ;;  %vm531_vm12 = vcmp.ne.s32.totalorder %v417_v26, 15 }
  0xcd   : > { %v602_v42 = vsel %vm3735_vm5, %v591_v54, %v592_v62  ;;  %vm3736_vm13 = vmmov %vm3735_vm5 }
  0xce   : > { %v599_v43 = vsel %vm3736_vm13, %v594_v6, %v595_v7  ;;  %vm3737_vm2 = vmmov %vm3735_vm5  ;;  %v2069_v17 = vpack.c.bf16 %v601_v38, %v602_v42 }
  0xcf   : > { %v600_v11 = vsel %vm3737_vm2, %v593_v63, %v594_v6  ;;  %v598_v36 = vsel %vm3737_vm2, %v595_v7, %v596_v18  ;;  %vm3747_vm13 = vmmov %vm3737_vm2  ;;  %v2617_v7 = vld [vmem:[#allocation7 + $0x8] sm:$0xff]  }
  0xd0   : > { %v2072_v22 = vpack.c.bf16 %v599_v43, %v600_v11 }
  0xd3   : > { %2339 = vmatmul.mubr.msk.bf16.gmra.mrb[4].mxu0 %vm3285_vm0, %v2063_v60 }
  0xd4   : > { %2342 = vmatprep.mubr.msk.bf16.mxu0 %vm3292_vm1, %v2066_v3  ;;  %vm3738_vm1 = vmmov 1  }
  0xd5   : > { %vm3311_vm0 = vmpackc.low %vm527_vm4, %vm3738_vm1 }
  0xd6   : > { %vm3316_vm5 = vmpackc.low %vm529_vm9, %vm3738_vm1 }
  0xd7   : > { %vm3743_vm4 = vmmov %vm3737_vm2 }
  0xd8   : > { %v613_v28 = vsel %vm3743_vm4, %v596_v18, %v581_v2  ;;  %vm3331_vm9 = vmpackc.low %vm531_vm12, %vm3738_vm1  ;;  %v3340_v2 = vld [vmem:[%s3680_s2] ss:$0 sm:$0xff]  ;;  %vm3746_vm1 = vcmp.lt.s32.totalorder %v3064_v23, 1  ;;  %v2626_v23 = vld [vmem:[#allocation7 + $0x90] sm:$0xff]  }
  0xd9   : > { %v2075_v30 = vpack.c.bf16 %v613_v28, %v598_v36  ;;  %v3745_v31 = vsel %vm3331_vm9, 4294967295, %v3744_v31  ;;  %vm3748_vm2 = vmmov %vm3746_vm1 }
  0xda   : > { %vm3749_vm4 = vmmov %vm3746_vm1 }
  0xdb   : > { %2343 = vmatmul.mubr.msk.bf16.gmra.mrb[8].mxu0 %vm3311_vm0, %v2069_v17  ;;  %vm3750_vm12 = vmmov %vm3747_vm13 }
  0xdc   : > { %2346 = vmatprep.mubr.msk.bf16.mxu0 %vm3316_vm5, %v2072_v22 }
  0xe3   : > { %2347 = vmatmul.mubr.msk.bf16.gmra.mrb[12].mxu0 %vm3331_vm9, %v2075_v30 }
 0x19e   : > { %v2336_v12 = vpop.f32.mrb[0].mxu0 }
 0x19f   : > { %v1164_v14 = vadd.f32 %v2336_v12, %v3340_v2  ;;  %v1076_v35 = vpop.f32.mrb[1].mxu0 }
 0x1a0   : > { %v1162_v15 = vadd.f32 %v3340_v2, %v1076_v35  ;;  %v2337_v20 = vpop.f32.mrb[2].mxu0 }
 0x1a1   : > { %v1180_v40 = vmax.f32 %v1164_v14, 0.0  ;;  %v1165_v41 = vadd.f32 %v2337_v20, %v3340_v2  ;;  %v1079_v44 = vpop.f32.mrb[3].mxu0 }
 0x1a2   : > { %v3345_v46 = vmax.f32 %v1162_v15, 0.0  ;;  %v1163_v47 = vadd.f32 %v3340_v2, %v1079_v44 }
 0x1a3   : > { %v1181_v48 = vmax.f32 %v1165_v41, 0.0  ;;  %v1196_v52 = vrot.slane %v1180_v40, 7  ;;  %v1244_v54 = vrot.slane %v1180_v40, 1 }
 0x1a4   : > { %v1179_v53 = vmax.f32 %v1163_v47, 0.0  ;;  %v1194_v27 = vrot.slane %v3345_v46, 7  ;;  %v3696_v60 = vrot.slane %v3345_v46, 1 }
 0x1a5   : > { %v1197_v56 = vrot.slane %v1181_v48, 7  ;;  %v1245_v21 = vrot.slane %v1181_v48, 1  ;;  %v1315_v25 = vpack.c.bf16 %v1181_v48, %v1180_v40 }
 0x1a6   : > { %v1195_v37 = vrot.slane %v1179_v53, 7  ;;  %v1243_v57 = vrot.slane %v1179_v53, 1  ;;  %v2340_v58 = vpop.f32.mrb[4].mxu0  ;;  %v1314_v59 = vpack.c.bf16 %v1179_v53, %v3345_v46 }
 0x1a7   : > { %v3353_v62 = vsel %vm3746_vm1, %v1196_v52, %v1197_v56  ;;  %v3357_v63 = vsel %vm3747_vm13, %v1244_v54, %v1245_v21  ;;  %v1168_v3 = vadd.f32 %v2340_v58, %v3340_v2  ;;  %v1092_v6 = vpop.f32.mrb[5].mxu0  ;;  %vm3751_vm1 = vmmov %vm3750_vm12 }
 0x1a8   : > { %v3362_v10 = vsel %vm3748_vm2, %v1195_v37, %v1196_v52  ;;  %v1166_v5 = vadd.f32 %v3340_v2, %v1092_v6  ;;  %v2341_v38 = vpop.f32.mrb[6].mxu0  ;;  %2366 = vmatprep.mubr.bf16.mxu1 %v1314_v59  ;;  %v3369_v42 = vsel %vm3749_vm4, %v1194_v27, %v1195_v37  ;;  %v3373_v43 = vsel %vm3750_vm12, %v1243_v57, %v1244_v54  ;;  %vm3752_vm13 = vmmov %vm3751_vm1  ;;  %v2619_v37 = vld [vmem:[#allocation7 + $0x18] sm:$0xff]  }
 0x1a9   : > { %v1184_v13 = vmax.f32 %v1168_v3, 0.0  ;;  %v1169_v17 = vadd.f32 %v2341_v38, %v3340_v2  ;;  %v1095_v18 = vpop.f32.mrb[7].mxu0  ;;  %2367 = vmatmul.mubr.bf16.vlgmr.msra.gmra.mrb[0].mxu1 %v1315_v25  ;;  %v3382_v22 = vsel %vm3751_vm1, %v3696_v60, %v1243_v57  ;;  %vm3753_vm4 = vmmov %vm3748_vm2 }
 0x1aa   : > { %v1182_v26 = vmax.f32 %v1166_v5, 0.0  ;;  %v1167_v36 = vadd.f32 %v3340_v2, %v1095_v18  ;;  %2383 = vmatpush3.bf16.msra.mxu1 %v2616_v4  ;;  %vm3754_vm12 = vmmov %vm3748_vm2 }
 0x1ab   : > { %v3387_v30 = vmax.f32 %v1169_v17, 0.0  ;;  %2384 = vmatprep.subr.bf16.mxu1 %v2617_v7  ;;  %v1200_v33 = vrot.slane %v1184_v13, 7  ;;  %v1248_v15 = vrot.slane %v1184_v13, 1  ;;  %vm3755_vm1 = vmmov %vm3748_vm2 }
 0x1ac   : > { %v1198_v12 = vrot.slane %v1182_v26, 7  ;;  %v1246_v14 = vrot.slane %v1182_v26, 1  ;;  %v1183_v35 = vmax.f32 %v1167_v36, 0.0 }
 0x1ad   : > { %v1201_v20 = vrot.slane %v3387_v30, 7  ;;  %v1249_v40 = vrot.slane %v3387_v30, 1  ;;  %v1317_v41 = vpack.c.bf16 %v3387_v30, %v1184_v13 }
 0x1ae   : > { %v3394_v4 = vsel %vm3752_vm13, %v1245_v21, %v1246_v14  ;;  %v1199_v44 = vrot.slane %v1183_v35, 7  ;;  %v1247_v47 = vrot.slane %v1183_v35, 1  ;;  %v2344_v48 = vpop.f32.mrb[8].mxu0  ;;  %2385 = vmatpush3.bf16.msra.mxu1 %v2617_v7  ;;  %v1316_v52 = vpack.c.bf16 %v1183_v35, %v1182_v26 }
 0x1af   : > { %v1172_v54 = vadd.f32 %v2344_v48, %v3340_v2  ;;  %v1108_v25 = vpop.f32.mrb[9].mxu0  ;;  %2386 = vmatprep.subr.bf16.mxu1 %v2618_v32  ;;  %v3401_v57 = vsel %vm3748_vm2, %v1197_v56, %v1198_v12  ;;  %v3405_v21 = vsel %vm3753_vm4, %v1200_v33, %v1201_v20  ;;  %vm3756_vm2 = vmmov %vm3752_vm13  ;;  %v3779_v0 = vpack.c.bf16 %v3394_v4, %v3357_v63  ;;  %v2633_v4 = vld [vmem:[%s3024_s6] sm:$0xff] }
 0x1b0   : > { %v1170_v58 = vadd.f32 %v3340_v2, %v1108_v25  ;;  %v2345_v59 = vpop.f32.mrb[10].mxu0  ;;  %2370 = vmatprep.mubr.bf16.mxu1 %v1316_v52  ;;  %v3410_v3 = vsel %vm3754_vm12, %v1198_v12, %v1199_v44  ;;  %v3414_v6 = vsel %vm3755_vm1, %v1199_v44, %v1200_v33  ;;  %v3418_v56 = vsel %vm3752_vm13, %v1247_v47, %v1248_v15  ;;  %vm3757_vm4 = vmmov %vm3756_vm2  ;;  %v2620_v12 = vld [vmem:[#allocation7 + $0x20] sm:$0xff]  }
 0x1b1   : > { %v1188_v7 = vmax.f32 %v1172_v54, 0.0  ;;  %v1173_v5 = vadd.f32 %v2345_v59, %v3340_v2  ;;  %v1111_v38 = vpop.f32.mrb[11].mxu0  ;;  %2371 = vmatmul.mubr.bf16.gmra.mrb[4].mxu1 %v1317_v41  ;;  %v3428_v36 = vsel %vm3756_vm2, %v1246_v14, %v1247_v47  ;;  %v3432_v30 = vsel %vm3757_vm4, %v1248_v15, %v1249_v40  ;;  %vm3758_vm12 = vmmov %vm3755_vm1 }
 0x1b2   : > { %v1186_v18 = vmax.f32 %v1170_v58, 0.0  ;;  %v1171_v26 = vadd.f32 %v3340_v2, %v1111_v38  ;;  %2387 = vmatpush3.bf16.msra.mxu1 %v2618_v32  ;;  %vm3759_vm13 = vmmov %vm3756_vm2  ;;  %v3774_v61 = vpack.c.bf16 %v3410_v3, %v3401_v57  ;;  %v3781_v8 = vpack.c.bf16 %v3418_v56, %v3428_v36  ;;  %v2634_v3 = vld [vmem:[%s3024_s6 + $0x18] sm:$0xff]  ;;  %v2635_v36 = vld [vmem:[%s3024_s6 + $0x8] sm:$0xff] }
 0x1b3   : > { %v3434_v33 = vmax.f32 %v1173_v5, 0.0  ;;  %2388 = vmatprep.subr.bf16.mxu1 %v2619_v37  ;;  %v1204_v41 = vrot.slane %v1188_v7, 7  ;;  %v1252_v32 = vrot.slane %v1188_v7, 1  ;;  %vm3760_vm4 = vmmov %vm3755_vm1 }
 0x1b4   : > { %v1202_v44 = vrot.slane %v1186_v18, 7  ;;  %v1250_v48 = vrot.slane %v1186_v18, 1  ;;  %v1187_v52 = vmax.f32 %v1171_v26, 0.0  ;;  %v2621_v26 = vld [vmem:[#allocation7 + $0x28] sm:$0xff]  }
 0x1b5   : > { %v1205_v54 = vrot.slane %v3434_v33, 7  ;;  %v1253_v14 = vrot.slane %v3434_v33, 1  ;;  %v1319_v47 = vpack.c.bf16 %v3434_v33, %v1188_v7 }
 0x1b6   : > { %v1203_v15 = vrot.slane %v1187_v52, 7  ;;  %v1251_v25 = vrot.slane %v1187_v52, 1  ;;  %v2348_v58 = vpop.f32.mrb[12].mxu0  ;;  %2389 = vmatpush3.bf16.msra.mxu1 %v2619_v37  ;;  %v1318_v59 = vpack.c.bf16 %v1187_v52, %v1186_v18  ;;  %v3443_v5 = vsel %vm3758_vm12, %v1201_v20, %v1202_v44  ;;  %vm3761_vm12 = vmmov %vm3755_vm1 }
 0x1b7   : > { %v1176_v38 = vadd.f32 %v2348_v58, %v3340_v2  ;;  %v1124_v35 = vpop.f32.mrb[13].mxu0  ;;  %2390 = vmatprep.subr.bf16.mxu1 %v2620_v12  ;;  %v3448_v53 = vsel %vm3755_vm1, %v1204_v41, %v1205_v54  ;;  %v3452_v7 = vsel %vm3759_vm13, %v1249_v40, %v1250_v48  ;;  %v3456_v37 = vsel %vm3756_vm2, %v1252_v32, %v1253_v14  ;;  %vm3762_vm1 = vmmov %vm3756_vm2 }
 0x1b8   : > { %v1174_v20 = vadd.f32 %v3340_v2, %v1124_v35  ;;  %v2349_v18 = vpop.f32.mrb[14].mxu0  ;;  %2374 = vmatprep.mubr.bf16.mxu1 %v1318_v59  ;;  %v3461_v33 = vsel %vm3760_vm4, %v1202_v44, %v1203_v15  ;;  %v3465_v52 = vsel %vm3761_vm12, %v1203_v15, %v1204_v41  ;;  %v3477_v41 = vsel %vm3762_vm1, %v1251_v25, %v1252_v32  ;;  %vm3763_vm13 = vmmov %vm3762_vm1 }
 0x1b9   : > { %v1192_v58 = vmax.f32 %v1176_v38, 0.0  ;;  %v1177_v28 = vadd.f32 %v2349_v18, %v3340_v2  ;;  %v1127_v17 = vpop.f32.mrb[15].mxu0  ;;  %2375 = vmatmul.mubr.bf16.gmra.mrb[8].mxu1 %v1319_v47  ;;  %v2107_v35 = vpack.c.bf16 %v3461_v33, %v3443_v5  ;;  %v3481_v15 = vsel %vm3763_vm13, %v1250_v48, %v1251_v25  ;;  %v2622_v47 = vld [vmem:[#allocation7 + $0x30] sm:$0xff]   ;;  %vm3764_vm2 = vmmov %vm3760_vm4  ;;  %v2623_v25 = vld [vmem:[#allocation7 + $0x38] sm:$0xff]  }
 0x1ba   : > { %v1190_v44 = vmax.f32 %v1174_v20, 0.0  ;;  %v1175_v13 = vadd.f32 %v3340_v2, %v1127_v17  ;;  %2391 = vmatpush3.bf16.msra.mxu1 %v2620_v12  ;;  %vm3765_vm4 = vmmov %vm3764_vm2  ;;  %v3783_v29 = vpack.c.bf16 %v3452_v7, %v3432_v30 }
 0x1bb   : > { %v1193_v38 = vmax.f32 %v1177_v28, 0.0  ;;  %2392 = vmatprep.subr.bf16.mxu1 %v2621_v26  ;;  %v1208_v18 = vrot.slane %v1192_v58, 7  ;;  %v1256_v2 = vrot.slane %v1192_v58, 1  ;;  %vm3766_vm12 = vmmov %vm3764_vm2 }
 0x1bc   : > { %v1206_v33 = vrot.slane %v1190_v44, 7  ;;  %v1254_v20 = vrot.slane %v1190_v44, 1  ;;  %v1191_v40 = vmax.f32 %v1175_v13, 0.0  ;;  %vm3767_vm13 = vmmov %vm3762_vm1 }
 0x1bd   : > { %v1209_v17 = vrot.slane %v1193_v38, 7  ;;  %v1257_v12 = vrot.slane %v1193_v38, 1  ;;  %v1321_v59 = vpack.c.bf16 %v1193_v38, %v1192_v58  ;;  %vm3768_vm9 = vmmov %vm3764_vm2 }
 0x1be   : > { %v1207_v32 = vrot.slane %v1191_v40, 7  ;;  %v1255_v11 = vrot.slane %v1191_v40, 1  ;;  %2393 = vmatpush3.bf16.msra.mxu1 %v2621_v26  ;;  %v1320_v60 = vpack.c.bf16 %v1191_v40, %v1190_v44  ;;  %v1213_v28 = vsel %vm3764_vm2, %v1205_v54, %v1206_v33 }
 0x1bf   : > { %2394 = vmatprep.subr.bf16.mxu1 %v2622_v47  ;;  %v1225_v48 = vsel %vm3765_vm4, %v1209_v17, %v1194_v27  ;;  %v1210_v13 = vsel %vm3766_vm12, %v1208_v18, %v1209_v17  ;;  %v1261_v58 = vsel %vm3762_vm1, %v1253_v14, %v1254_v20  ;;  %v1258_v26 = vsel %vm3767_vm13, %v1256_v2, %v1257_v12  ;;  %vm3769_vm4 = vmmov %vm3762_vm1 }
 0x1c0   : > { %2378 = vmatprep.mubr.bf16.mxu1 %v1320_v60  ;;  %v2095_v40 = vpack.c.bf16 %v3369_v42, %v1225_v48  ;;  %v1212_v54 = vsel %vm3764_vm2, %v1206_v33, %v1207_v32  ;;  %v1211_v44 = vsel %vm3768_vm9, %v1207_v32, %v1208_v18  ;;  %v2142_v27 = vpack.c.bf16 %v1261_v58, %v3456_v37  ;;  %vm3770_vm12 = vmmov %vm3762_vm1  ;;  %v2624_v37 = vld [vmem:[#allocation7 + $0x80] sm:$0xff]   ;;  %v2625_v33 = vld [vmem:[#allocation7 + $0x88] sm:$0xff]  }
 0x1c1   : > { %2379 = vmatmul.mubr.bf16.gmra.mrb[12].mxu1 %v1321_v59  ;;  %v2113_v38 = vpack.c.bf16 %v1212_v54, %v1213_v28  ;;  %v2116_v17 = vpack.c.bf16 %v1210_v13, %v1211_v44  ;;  %v1259_v14 = vsel %vm3769_vm4, %v1255_v11, %v1256_v2  ;;  %v1260_v5 = vsel %vm3770_vm12, %v1254_v20, %v1255_v11  ;;  %vm3772_vm9 = vmmov %vm3762_vm1  ;;  %v2636_v20 = vld [vmem:[%s3024_s6 + $0x30] sm:$0xff]  ;;  %v2637_v48 = vld [vmem:[%s3024_s6 + $0x20] sm:$0xff] }
 0x1c2   : > { %2395 = vmatpush3.bf16.msra.mxu1 %v2622_v47  ;;  %2398 = vmatprep.mubr.msk.bf16.mxu1 %vm3120_vm3, %v2095_v40  ;;  %v2145_v60 = vpack.c.bf16 %v1259_v14, %v1260_v5  ;;  %v3771_v42 = vrot.slane %v3345_v46, 1  ;;  %v3773_v2 = vpack.c.bf16 %v3353_v62, %v3362_v10  ;;  %v2627_v46 = vld [vmem:[#allocation7 + $0x98] sm:$0xff]   ;;  %v3775_v11 = vpack.c.bf16 %v3405_v21, %v3414_v6  ;;  %v2639_v44 = vld [vmem:[%s3024_s6 + $0x28] sm:$0xff] }
 0x1c3   : > { %2396 = vmatprep.subr.bf16.mxu1 %v2623_v25  ;;  %v3776_v62 = vpack.c.bf16 %v3448_v53, %v3465_v52  ;;  %v3777_v10 = vpack.c.bf16 %v3373_v43, %v3382_v22  ;;  %vm3778_vm3 = vnez %v3725_v34  ;;  %v3785_v34 = vpack.c.bf16 %v3477_v41, %v3481_v15 }
 0x1c4   : > { %v1273_v18 = vsel %vm3772_vm9, %v1257_v12, %v3771_v42 }
 0x1c5   : > { %v2148_v59 = vpack.c.bf16 %v1273_v18, %v1258_v26  ;;  %v2638_v26 = vld [vmem:[%s3024_s6 + $0x38] sm:$0xff] }
 0x1c6   : > { %2397 = vmatpush3.bf16.msra.mxu1 %v2623_v25 }
 0x1c7   : > { %2414 = vmatprep.subr.bf16.mxu1 %v2624_v37 }
 0x1c9   : > { %2399 = vmatmul.mubr.msk.bf16.vlgmr.msra.gmra.mrb[0].mxu1 %vm3140_vm6, %v3773_v2  ;;  %vm3780_vm6 = vnez %v3727_v50  ;;  %v3573_v50 = vld [vmem:[%s3682_s4] ss:$0 sm:$0xff] }
 0x1ca   : > { %2402 = vmatprep.mubr.msk.bf16.mxu1 %vm3147_vm7, %v3774_v61  ;;  %2415 = vmatpush3.bf16.msra.mxu1 %v2624_v37  ;;  %vm3782_vm7 = vnez %v3729_v55 }
 0x1cb   : > { %2416 = vmatprep.subr.bf16.mxu1 %v2625_v33 }
 0x1ce   : > { %2417 = vmatpush3.bf16.msra.mxu1 %v2625_v33 }
 0x1cf   : > { %2418 = vmatprep.subr.bf16.mxu1 %v2626_v23 }
 0x1d1   : > { %2403 = vmatmul.mubr.msk.bf16.gmra.mrb[4].mxu1 %vm3168_vm10, %v3775_v11  ;;  %vm3784_vm10 = vnez %v3731_v1 }
 0x1d2   : > { %2406 = vmatprep.mubr.msk.bf16.mxu1 %vm3175_vm11, %v2107_v35  ;;  %2419 = vmatpush3.bf16.msra.mxu1 %v2626_v23  ;;  %vm3786_vm11 = vnez %v3733_v9  ;;  %v2641_v23 = vld [vmem:[%s3024_s6 + $0x40] sm:$0xff] }
 0x1d3   : > { %2420 = vmatprep.subr.bf16.mxu1 %v2627_v46 }
 0x1d6   : > { %2421 = vmatpush3.bf16.msra.mxu1 %v2627_v46 }
 0x1d7   : > { %2422 = vmatprep.subr.bf16.mxu1 %v2628_v16 }
 0x1d9   : > { %2407 = vmatmul.mubr.msk.bf16.gmra.mrb[8].mxu1 %vm3195_vm14, %v3776_v62  ;;  %vm3787_vm14 = vnez %v3745_v31 }
 0x1da   : > { %2410 = vmatprep.mubr.msk.bf16.mxu1 %vm3203_vm15, %v2113_v38  ;;  %2423 = vmatpush3.bf16.msra.mxu1 %v2628_v16 }
 0x1db   : > { %2424 = vmatprep.subr.bf16.mxu1 %v2629_v24 }
 0x1de   : > { %2425 = vmatpush3.bf16.msra.mxu1 %v2629_v24  ;;  %v2642_v24 = vld [vmem:[%s3024_s6 + $0x58] sm:$0xff] }
 0x1df   : > { %2426 = vmatprep.subr.bf16.mxu1 %v2630_v45 }
 0x1e1   : > { %2411 = vmatmul.mubr.msk.bf16.gmra.mrb[12].mxu1 %vm3229_vm8, %v2116_v17 }
 0x1e2   : > { %2427 = vmatpush3.bf16.msra.mxu1 %v2630_v45  ;;  %2430 = vmatprep.mubr.msk.bf16.mxu1 %vm3778_vm3, %v3777_v10 }
 0x1e3   : > { %2428 = vmatprep.subr.bf16.mxu1 %v2631_v51 }
 0x1e6   : > { %2429 = vmatpush3.bf16.msra.mxu1 %v2631_v51  ;;  %v2643_v51 = vld [vmem:[%s3024_s6 + $0x48] sm:$0xff] }
 0x1e9   : > { %2431 = vmatmul.mubr.msk.bf16.vlgmr.msra.gmra.mrb[0].mxu1 %vm3780_vm6, %v3779_v0 }
 0x1ea   : > { %2434 = vmatprep.mubr.msk.bf16.mxu1 %vm3782_vm7, %v3781_v8 }
 0x1f1   : > { %2435 = vmatmul.mubr.msk.bf16.gmra.mrb[4].mxu1 %vm3784_vm10, %v3783_v29 }
 0x1f2   : > { %2438 = vmatprep.mubr.msk.bf16.mxu1 %vm3786_vm11, %v3785_v34 }
 0x1f9   : > { %2439 = vmatmul.mubr.msk.bf16.gmra.mrb[8].mxu1 %vm3311_vm0, %v2142_v27 }
 0x1fa   : > { %2442 = vmatprep.mubr.msk.bf16.mxu1 %vm3316_vm5, %v2145_v60 }
 0x201   : > { %2443 = vmatmul.mubr.msk.bf16.gmra.mrb[12].mxu1 %vm3787_vm14, %v2148_v59  ;;  %v2640_v59 = vld [vmem:[%s3024_s6 + $0x50] sm:$0xff] }
 0x2bc   : > { %v2432_v55 = vpop.f32.mrb[0].mxu1 }
 0x2bd   : > { %v1824_v1 = vadd.f32 %v2432_v55, %v3573_v50  ;;  %v1736_v9 = vpop.f32.mrb[1].mxu1 }
 0x2be   : > { %v1822_v19 = vadd.f32 %v3573_v50, %v1736_v9  ;;  %v2433_v63 = vpop.f32.mrb[2].mxu1 }
 0x2bf   : > { %v1840_v43 = vadd.f32 %v2632_v39, %v1824_v1  ;;  %v1825_v31 = vadd.f32 %v2433_v63, %v3573_v50  ;;  %v1739_v22 = vpop.f32.mrb[3].mxu1 }
 0x2c0   : > { %v1838_v53 = vadd.f32 %v2633_v4, %v1822_v19  ;;  %v1823_v57 = vadd.f32 %v3573_v50, %v1739_v22 }
 0x2c1   : > { %v1856_v21 = vmax.f32 %v1840_v43, 0.0  ;;  %v1841_v6 = vadd.f32 %v2634_v3, %v1825_v31  ;;  %v2644_v43 = vld [vmem:[%s3024_s6 + $0x60] sm:$0xff]  ;;  %v2646_v3 = vld [vmem:[%s3024_s6 + $0x68] sm:$0xff] }
 0x2c2   : > { %v1854_v56 = vmax.f32 %v1838_v53, 0.0  ;;  %v1839_v30 = vadd.f32 %v2635_v36, %v1823_v57  ;;  %v2645_v53 = vld [vmem:[%s3024_s6 + $0x78] sm:$0xff] }
 0x2c3   : > { %1872 = vst [vmem:[%s3585_s11 + $0x10] sm:$0xff] %v1856_v21  ;;  %v1857_v7 = vmax.f32 %v1841_v6, 0.0 }
 0x2c4   : > { %1870 = vst [vmem:[%s3585_s11] sm:$0xff] %v1854_v56  ;;  %v1855_v52 = vmax.f32 %v1839_v30, 0.0  ;;  %v2436_v35 = vpop.f32.mrb[4].mxu1 }
 0x2c5   : > { %1873 = vst [vmem:[%s3585_s11 + $0x18] sm:$0xff] %v1857_v7  ;;  %v1828_v41 = vadd.f32 %v2436_v35, %v3573_v50  ;;  %v1752_v15 = vpop.f32.mrb[5].mxu1 }
 0x2c6   : > { %1871 = vst [vmem:[%s3585_s11 + $0x8] sm:$0xff] %v1855_v52  ;;  %v1826_v47 = vadd.f32 %v3573_v50, %v1752_v15  ;;  %v2437_v5 = vpop.f32.mrb[6].mxu1 }
 0x2c7   : > { %v1844_v12 = vadd.f32 %v2636_v20, %v1828_v41  ;;  %v1829_v32 = vadd.f32 %v2437_v5, %v3573_v50  ;;  %v1755_v28 = vpop.f32.mrb[7].mxu1 }
 0x2c8   : > { %v1842_v25 = vadd.f32 %v2637_v48, %v1826_v47  ;;  %v1827_v13 = vadd.f32 %v3573_v50, %v1755_v28 }
 0x2c9   : > { %v1860_v58 = vmax.f32 %v1844_v12, 0.0  ;;  %v1845_v40 = vadd.f32 %v2638_v26, %v1829_v32 }
 0x2ca   : > { %v1858_v54 = vmax.f32 %v1842_v25, 0.0  ;;  %v1843_v27 = vadd.f32 %v2639_v44, %v1827_v13 }
 0x2cb   : > { %1876 = vst [vmem:[%s3585_s11 + $0x30] sm:$0xff] %v1860_v58  ;;  %v1861_v38 = vmax.f32 %v1845_v40, 0.0 }
 0x2cc   : > { %1874 = vst [vmem:[%s3585_s11 + $0x20] sm:$0xff] %v1858_v54  ;;  %v1859_v17 = vmax.f32 %v1843_v27, 0.0  ;;  %v2440_v14 = vpop.f32.mrb[8].mxu1 }
 0x2cd   : > { %1877 = vst [vmem:[%s3585_s11 + $0x38] sm:$0xff] %v1861_v38  ;;  %v1832_v60 = vadd.f32 %v2440_v14, %v3573_v50  ;;  %v1768_v42 = vpop.f32.mrb[9].mxu1 }
 0x2ce   : > { %1875 = vst [vmem:[%s3585_s11 + $0x28] sm:$0xff] %v1859_v17  ;;  %v1830_v18 = vadd.f32 %v3573_v50, %v1768_v42  ;;  %v2441_v37 = vpop.f32.mrb[10].mxu1 }
 0x2cf   : > { %v1848_v33 = vadd.f32 %v2640_v59, %v1832_v60  ;;  %v1833_v2 = vadd.f32 %v2441_v37, %v3573_v50  ;;  %v1771_v61 = vpop.f32.mrb[11].mxu1 }
 0x2d0   : > { %v1846_v46 = vadd.f32 %v2641_v23, %v1830_v18  ;;  %v1831_v11 = vadd.f32 %v3573_v50, %v1771_v61 }
 0x2d1   : > { %v1864_v16 = vmax.f32 %v1848_v33, 0.0  ;;  %v1849_v62 = vadd.f32 %v2642_v24, %v1833_v2 }
 0x2d2   : > { %v1862_v45 = vmax.f32 %v1846_v46, 0.0  ;;  %v1847_v10 = vadd.f32 %v2643_v51, %v1831_v11 }
 0x2d3   : > { %1880 = vst [vmem:[%s3585_s11 + $0x50] sm:$0xff] %v1864_v16  ;;  %v1865_v0 = vmax.f32 %v1849_v62, 0.0 }
 0x2d4   : > { %1878 = vst [vmem:[%s3585_s11 + $0x40] sm:$0xff] %v1862_v45  ;;  %v1863_v8 = vmax.f32 %v1847_v10, 0.0  ;;  %v2444_v29 = vpop.f32.mrb[12].mxu1 }
 0x2d5   : > { %1881 = vst [vmem:[%s3585_s11 + $0x58] sm:$0xff] %v1865_v0  ;;  %v1836_v34 = vadd.f32 %v2444_v29, %v3573_v50  ;;  %v1784_v55 = vpop.f32.mrb[13].mxu1 }
 0x2d6   : > { %1879 = vst [vmem:[%s3585_s11 + $0x48] sm:$0xff] %v1863_v8  ;;  %v1834_v1 = vadd.f32 %v3573_v50, %v1784_v55  ;;  %v2445_v9 = vpop.f32.mrb[14].mxu1 }
 0x2d7   : > { %v1852_v19 = vadd.f32 %v1836_v34, %v3104_v49  ;;  %v1837_v63 = vadd.f32 %v2445_v9, %v3573_v50  ;;  %v1787_v39 = vpop.f32.mrb[15].mxu1 }
 0x2d8   : > { %v1850_v31 = vadd.f32 %v2644_v43, %v1834_v1  ;;  %v1835_v22 = vadd.f32 %v3573_v50, %v1787_v39 }
 0x2d9   : > { %v1868_v4 = vmax.f32 %v1852_v19, 0.0  ;;  %v1853_v57 = vadd.f32 %v2645_v53, %v1837_v63 }
 0x2da   : > { %v1866_v21 = vmax.f32 %v1850_v31, 0.0  ;;  %v1851_v49 = vadd.f32 %v2646_v3, %v1835_v22 }
 0x2db   : > { %1884 = vst [vmem:[%s3585_s11 + $0x70] sm:$0xff] %v1868_v4  ;;  %v1869_v6 = vmax.f32 %v1853_v57, 0.0 }
 0x2dc   : > { %1882 = vst [vmem:[%s3585_s11 + $0x60] sm:$0xff] %v1866_v21  ;;  %v1867_v50 = vmax.f32 %v1851_v49, 0.0 }
 0x2dd   : > { %1885 = vst [vmem:[%s3585_s11 + $0x78] sm:$0xff] %v1869_v6 }
 0x2de   : > { %1883 = vst [vmem:[%s3585_s11 + $0x68] sm:$0xff] %v1867_v50 }
 0x2df   : > { %2746 = shalt.err (!%p2743_p2)
}
 0x2e0   : > { %s2747_s6 = scalar_lea.hbm %s3629_s9, 2048  ;;  %s2751_s8 = scalar_lea.hbm %s3683_s5, 4096 }
 0x2e1   : > { %p2748_p13 = scmp.ne.s32.totalorder %s3629_s9, %s2747_s6  ;;  %p2752_p4 = scmp.lt.u32.totalorder %s3629_s9, %s3683_s5 }
 0x2e2   : > { %p2753_p5 = scmp.lt.u32.totalorder %s2751_s8, %s2747_s6  ;;  %p2755_p11 = scmp.lt.u32.totalorder %s2747_s6, %s3629_s9 }
 0x2e3   : > { %p2749_p6 = pnand %p2748_p13, %p3788_p0 }
 0x2e4   : > { %p2754_p8 = por %p2753_p5, %p2752_p4 }
 0x2e5   : > { %p2750_p10 = pneg %p2749_p6 }
 0x2e6   : > { %p2756_p1 = por %p2755_p11, %p2754_p8 }
 0x2e8   : > { %p2757_p3 = pnand %p2756_p1, %p2750_p10 }
 0x2ea   : > { %2760 = shalt.err (!%p2757_p3)
}
 0x2eb   : > { %s2814_s28 = smov 128   ;;  %s2815_s15 = smov 8  }
 0x2ec   : > { %2520 = dma.vmem_to_hbm [thread:$0]  (%p3788_p0), %s3631_s30, 2048, %s3629_s9, %s1887_s22, %s2814_s28, %s2814_s28, %s2815_s15  }
 0x2ed PF: > { %s1915_s16 = sand.u32 1, %s2791_s18   ;;  %p3789_p7 = scmp.ne.s32.totalorder %s3699_s25, 0 }
 0x2ee   : > { %p3790_p9 = scmp.ge.s32.totalorder %s2803_s21, 2  ;;  %s1916_s12 = scalar_lea.sflag [#allocation4], %s1915_s16 }
 0x2f0   : > { %p2534_p12 = pnand %p3790_p9, %p3789_p7 }
 0x2f2   : > { %2786 = dma.done.wait (!%p2534_p12), %s1916_s12, 2048  }
 0x2f3   : > { %2788 = vsyncadd (!%p2534_p12), %s1916_s12, 4294965248  ;;  %p19_p2 = scmp.ge.s32.totalorder %s2956_s14, 4   ;;  %s3791_s18 = smov %s2795_s19 }
 0x2f4   : > { %s3792_s19 = smov %s2799_s20  ;;  %s3793_s20 = smov %s2972_s27 }
 0x2f5   : > { %s3794_s21 = smov %s2956_s14  ;;  %21 = sbr.rel (!%p19_p2) target bundleno = 6 (0x6), region = 97 }
 0x2fc   :  { %1921 = vsyncpa [#allocation3], 1 }
 0x2fd   :  { %1923 = vsyncpa [#allocation3 + $0x1], 1 }
 0x2fe   :  { %1924 = vsyncpa [#allocation6], 1 }
 0x2ff   :  { %1925 = vsyncpa [#allocation4], 1 }
 0x300   :  { %1927 = vsyncpa [#allocation4 + $0x1], 1 }

</bundles_post_ra>
